<compile_context>
chip_gen: v7x
topology: tpu7x:2x2x1
jax: 0.10.0
libtpu: 0.0.40
codegen_flags: <defaults>
</compile_context>

<pallas_src>
import functools

import jax
import jax.numpy as jnp
from jax import lax
from jax.experimental import pallas as pl
from jax.experimental.pallas import tpu as pltpu


def make_fused_gat_kernel(heads, out_ch, num_classes, slab_width,
                          negative_slope=0.2):
    """Fused 2-layer dense GATConv kernel (all compute on-chip, grid=(1,))."""
    hc = heads * out_ch

    def kernel(x_ref, adj_ref, w1aug_ref, asrc1_ref, b1_ref,
               w2aug_ref, asrc2_ref, b2_ref, slab_ref):
        n = x_ref.shape[0]

        # ---- additive adjacency mask, built ONCE in f32 (adj arrives bf16) ----
        adj = adj_ref[...].astype(jnp.float32)           # [N, N] rows=dst, cols=src
        mask_add = (adj - 1.0) * 1e30                    # 0 on edges, -1e30 elsewhere

        # ---- layer 1: feature transform + folded att_dst scores (one matmul) ----
        xb = x_ref[...].astype(jnp.bfloat16)             # [N, Fin]
        xp_aug = jnp.dot(xb, w1aug_ref[...],
                         preferred_element_type=jnp.float32)   # [N, hc+heads] f32
        xp = xp_aug[:, :hc]                              # transformed features
        a_d_all = xp_aug[:, hc:hc + heads]               # [N, heads] dst scores
        # src scores, produced row-oriented [heads, N] directly (dense [H,Fin]
        # weight pre-folded through w1 in the wrapper; no transpose needed).
        a_s_allT = lax.dot_general(asrc1_ref[...], xb, (((1,), (1,)), ((), ())),
                                   preferred_element_type=jnp.float32)
        xp_b = xp.astype(jnp.bfloat16)

        # column ids used to build per-head lane masks (static per head).
        col_ids = lax.broadcasted_iota(jnp.int32, (1, hc), 1)

        # ---- per-head attention + aggregation, accumulated in registers ----
        out1 = jnp.zeros((n, hc), jnp.float32)
        for h in range(heads):                           # static (unrolled) head loop
            lo = h * out_ch
            e = a_d_all[:, h:h + 1] + a_s_allT[h:h + 1, :]      # e[dst, src]
            e = jnp.where(e > 0, e, negative_slope * e)          # LeakyReLU
            e = e + mask_add                                     # mask non-edges
            m = jnp.max(e, axis=1, keepdims=True)
            p = jnp.exp(e - m)                                   # non-edges -> 0.0
            denom = jnp.sum(p, axis=1, keepdims=True)            # >= 1 (self loops)
            attn = p * pl.reciprocal(denom, approx=True)         # softmax (EUP)
            # lane-mask xp to this head's column slot so the matmul result lands
            # directly in out1[:, lo:lo+out_ch] (exact zeros elsewhere).
            mask_h = ((col_ids >= lo) & (col_ids < lo + out_ch)).astype(jnp.bfloat16)
            out1 = out1 + jnp.dot(attn.astype(jnp.bfloat16), xp_b * mask_h,
                                  preferred_element_type=jnp.float32)
        out1 = out1 + b1_ref[...]                        # [N, hc], stays in registers

        # ---- ELU (clamped-arg exp: no transient inf) ----
        x2 = jnp.where(out1 > 0.0, out1,
                       jnp.exp(jnp.minimum(out1, 0.0)) - 1.0)
        x2b = x2.astype(jnp.bfloat16)

        # ---- layer 2: GATConv(hc -> num_classes, heads=1), scores folded too ----
        xp2_aug = jnp.dot(x2b, w2aug_ref[...],
                          preferred_element_type=jnp.float32)    # [N, ncls+1]
        xp2 = xp2_aug[:, :num_classes]
        a_d2 = xp2_aug[:, num_classes:num_classes + 1]           # [N, 1]
        a_s2 = lax.dot_general(asrc2_ref[...], x2b, (((1,), (1,)), ((), ())),
                               preferred_element_type=jnp.float32)   # [1, N]
        e2 = a_d2 + a_s2
        e2 = jnp.where(e2 > 0, e2, negative_slope * e2)
        e2 = e2 + mask_add
        m2 = jnp.max(e2, axis=1, keepdims=True)
        p2 = jnp.exp(e2 - m2)
        d2 = jnp.sum(p2, axis=1, keepdims=True)                  # >= 1 (self loops)
        attn2 = p2 * pl.reciprocal(d2, approx=True)
        out2 = jnp.dot(attn2, xp2,
                       preferred_element_type=jnp.float32) + b2_ref[...]

        # ---- log_softmax(dim=1) ----
        mm = jnp.max(out2, axis=1, keepdims=True)
        lse = jnp.log(jnp.sum(jnp.exp(out2 - mm), axis=1, keepdims=True)) + mm
        logp = out2 - lse

        # ---- lane-dense [N, 128] output slab: [ out1 | logp | zero pad ] ----
        slab_ref[...] = jnp.zeros((n, slab_width), jnp.float32)
        slab_ref[:, :hc] = out1
        slab_ref[:, hc:hc + num_classes] = logp

    return kernel


@functools.partial(jax.jit, static_argnames=("hidden", "heads", "num_classes"))
def gat_forward(x, adj, params, *, hidden, heads, num_classes):
    N, Fin = x.shape
    H, C, ncls = heads, hidden, num_classes
    HC = H * C

    # ---- fold attention-score projections into the weight matmuls (wrapper) ----
    w1 = params["w1"]                                           # [Fin, HC]
    w1_3 = w1.reshape(Fin, H, C)
    adst1_cols = jnp.einsum("fhc,hc->fh", w1_3, params["adst1"])        # [Fin, H]
    w1_aug = jnp.concatenate([w1, adst1_cols], axis=1).astype(jnp.bfloat16)  # [Fin, HC+H]
    asrc1_fold = jnp.einsum("fhc,hc->hf", w1_3, params["asrc1"]).astype(jnp.bfloat16)  # [H, Fin]

    w2 = params["w2"]                                           # [HC, ncls]
    adst2_col = w2 @ params["adst2"].T                          # [HC, 1]
    w2_aug = jnp.concatenate([w2, adst2_col], axis=1).astype(jnp.bfloat16)   # [HC, ncls+1]
    asrc2_fold = (params["asrc2"] @ w2.T).astype(jnp.bfloat16)               # [1, HC]

    adj_b = adj.astype(jnp.bfloat16)            # halves adj DMA + VMEM vs f32
    slab_width = ((HC + ncls + 127) // 128) * 128

    kernel = make_fused_gat_kernel(heads=H, out_ch=C, num_classes=ncls,
                                   slab_width=slab_width)
    full = lambda a: pl.BlockSpec(a.shape, lambda i: (0,) * a.ndim)

    # advisory cost so XLA schedules surrounding ops around the fused kernel
    flops = int(2 * N * Fin * (HC + H) + 2 * H * N * Fin
                + H * (2 * N * N * C + 6 * N * N)
                + 2 * N * HC * (ncls + 1) + 2 * N * HC
                + 2 * N * N * ncls + 6 * N * N)
    transcendentals = int((H + 1) * N * N + N * HC + N * ncls)
    bytes_accessed = int(N * Fin * 4 + N * N * 2
                         + (w1_aug.size + asrc1_fold.size
                            + w2_aug.size + asrc2_fold.size) * 2
                         + (params["b1"].size + params["b2"].size) * 4
                         + N * slab_width * 4)

    args = (x, adj_b, w1_aug, asrc1_fold, params["b1"],
            w2_aug, asrc2_fold, params["b2"])

    slab = pl.pallas_call(
        kernel,
        out_shape=jax.ShapeDtypeStruct((N, slab_width), jnp.float32),
        grid=(1,),
        in_specs=[full(a) for a in args],
        out_specs=pl.BlockSpec((N, slab_width), lambda i: (0, 0)),
        compiler_params=pltpu.CompilerParams(
            dimension_semantics=("arbitrary",)),
        cost_estimate=pl.CostEstimate(flops=flops,
                                      transcendentals=transcendentals,
                                      bytes_accessed=bytes_accessed),
    )(*args)

    out1 = slab[:, :HC]
    logp = slab[:, HC:HC + ncls]
    return logp, out1


def gat_reference(x, adj, params, *, hidden, heads, num_classes,
                  negative_slope=0.2):
    """Pure-JAX f32 dense-GATConv x2 reference (eval mode) for tolerance check."""
    def layer(h_in, w, a_src, a_dst, b, n_heads, out_c):
        n = h_in.shape[0]
        xp = (h_in @ w).reshape(n, n_heads, out_c)
        a_s = jnp.einsum("nhc,hc->nh", xp, a_src)
        a_d = jnp.einsum("nhc,hc->nh", xp, a_dst)
        outs = []
        for h in range(n_heads):
            e = a_d[:, h][:, None] + a_s[:, h][None, :]       # e[dst, src]
            e = jnp.where(e > 0, e, negative_slope * e)
            e = jnp.where(adj > 0, e, -jnp.inf)
            e = e - jnp.max(e, axis=1, keepdims=True)
            p = jnp.exp(e)
            attn = p / jnp.sum(p, axis=1, keepdims=True)
            outs.append(attn @ xp[:, h, :])
        return jnp.concatenate(outs, axis=1) + b
    out1 = layer(x, params["w1"], params["asrc1"], params["adst1"],
                 params["b1"], heads, hidden)
    x2 = jax.nn.elu(out1)
    out2 = layer(x2, params["w2"], params["asrc2"], params["adst2"],
                 params["b2"], 1, num_classes)
    return jax.nn.log_softmax(out2, axis=1), out1


if __name__ == "__main__":
    N, FIN, HID, HEADS, NCLS, E = 32, 16, 8, 8, 4, 96

    key = jax.random.PRNGKey(0)
    keys = jax.random.split(key, 10)

    # node features + random edge_index [2, E]
    x = jax.random.normal(keys[0], (N, FIN), jnp.float32)
    src = jax.random.randint(keys[1], (E,), 0, N)
    dst = jax.random.randint(keys[2], (E,), 0, N)

    # dense adjacency (rows = dst, cols = src) + self loops
    # TODO(synk): edge_index -> dense adjacency scatter is done in plain JAX
    # (scatter has no clean single-kernel Pallas equivalent at this size).
    adj = jnp.zeros((N, N), jnp.float32).at[dst, src].set(1.0)
    adj = jnp.maximum(adj, jnp.eye(N, dtype=jnp.float32))

    def glorot(k, shape):
        fan = shape[0] + shape[-1]
        return jax.random.uniform(k, shape, jnp.float32, -1.0, 1.0) * jnp.sqrt(6.0 / fan)

    params = dict(
        # conv1: GATConv(FIN -> HID, heads=8)
        w1=glorot(keys[3], (FIN, HEADS * HID)),
        asrc1=glorot(keys[4], (HEADS, HID)),
        adst1=glorot(keys[5], (HEADS, HID)),
        b1=jnp.zeros((1, HEADS * HID), jnp.float32),
        # conv2: GATConv(8*HID -> NCLS, heads=1)
        w2=glorot(keys[6], (HEADS * HID, NCLS)),
        asrc2=glorot(keys[7], (1, NCLS)),
        adst2=glorot(keys[8], (1, NCLS)),
        b2=jnp.zeros((1, NCLS), jnp.float32),
    )
    # NOTE: fc1/fc2 (projection head) and the contrastive losses are not part
    # of forward(); dropout is identity in eval mode.

    logp, out1 = gat_forward(x, adj, params, hidden=HID, heads=HEADS,
                             num_classes=NCLS)
    jax.block_until_ready((logp, out1))
    assert logp.shape == (N, NCLS) and out1.shape == (N, HEADS * HID)

    # tolerance-asserted pure-JAX reference (bf16 matmuls + approx reciprocal
    # give ~1e-2 absolute deviation at these scales)
    logp_want, out1_want = gat_reference(x, adj, params, hidden=HID,
                                         heads=HEADS, num_classes=NCLS)
    assert float(jnp.max(jnp.abs(out1 - out1_want))) < 1e-1
    assert float(jnp.max(jnp.abs(logp - logp_want))) < 1e-1
    print("KERNEL_OK")
</pallas_src>

<mosaic_0001>
module attributes {stable_mosaic.version = 11 : i64} {
  func.func @kernel(%arg0: i32, %arg1: memref<32x16xf32, #tpu.memory_space<vmem>>, %arg2: memref<32x32xbf16, #tpu.memory_space<vmem>>, %arg3: memref<16x72xbf16, #tpu.memory_space<vmem>>, %arg4: memref<8x16xbf16, #tpu.memory_space<vmem>>, %arg5: memref<1x64xf32, #tpu.memory_space<vmem>>, %arg6: memref<64x5xbf16, #tpu.memory_space<vmem>>, %arg7: memref<1x64xbf16, #tpu.memory_space<vmem>>, %arg8: memref<1x4xf32, #tpu.memory_space<vmem>>, %arg9: memref<32x128xf32, #tpu.memory_space<vmem>>) attributes {dimension_semantics = [#tpu.dimension_semantics<arbitrary>], iteration_bounds = array<i64: 1>, scalar_prefetch = 0 : i64, scratch_operands = 0 : i64, tpu.core_type = #tpu.core_type<tc>, window_params = [{pipeline_mode = #tpu.pipeline_mode<synchronous>, transform_indices = @transform_0, window_bounds = array<i64: 32, 16>}, {pipeline_mode = #tpu.pipeline_mode<synchronous>, transform_indices = @transform_1, window_bounds = array<i64: 32, 32>}, {pipeline_mode = #tpu.pipeline_mode<synchronous>, transform_indices = @transform_2, window_bounds = array<i64: 16, 72>}, {pipeline_mode = #tpu.pipeline_mode<synchronous>, transform_indices = @transform_3, window_bounds = array<i64: 8, 16>}, {pipeline_mode = #tpu.pipeline_mode<synchronous>, transform_indices = @transform_4, window_bounds = array<i64: 1, 64>}, {pipeline_mode = #tpu.pipeline_mode<synchronous>, transform_indices = @transform_5, window_bounds = array<i64: 64, 5>}, {pipeline_mode = #tpu.pipeline_mode<synchronous>, transform_indices = @transform_6, window_bounds = array<i64: 1, 64>}, {pipeline_mode = #tpu.pipeline_mode<synchronous>, transform_indices = @transform_7, window_bounds = array<i64: 1, 4>}, {pipeline_mode = #tpu.pipeline_mode<synchronous>, transform_indices = @transform_8, window_bounds = array<i64: 32, 128>}]} {
    %c0 = arith.constant 0 : index
    %c0_0 = arith.constant 0 : index
    %0 = vector.load %arg2[%c0, %c0_0] : memref<32x32xbf16, #tpu.memory_space<vmem>>, vector<32x32xbf16>
    %1 = arith.extf %0 : vector<32x32xbf16> to vector<32x32xf32>
    %cst = arith.constant 1.000000e+00 : f32
    %2 = vector.broadcast %cst : f32 to vector<32x32xf32>
    %3 = arith.subf %1, %2 : vector<32x32xf32>
    %cst_1 = arith.constant 1.000000e+30 : f32
    %4 = vector.broadcast %cst_1 : f32 to vector<32x32xf32>
    %5 = arith.mulf %3, %4 : vector<32x32xf32>
    %c0_2 = arith.constant 0 : index
    %c0_3 = arith.constant 0 : index
    %6 = vector.load %arg1[%c0_2, %c0_3] : memref<32x16xf32, #tpu.memory_space<vmem>>, vector<32x16xf32>
    %7 = arith.truncf %6 : vector<32x16xf32> to vector<32x16xbf16>
    %c0_4 = arith.constant 0 : index
    %c0_5 = arith.constant 0 : index
    %8 = vector.load %arg3[%c0_4, %c0_5] : memref<16x72xbf16, #tpu.memory_space<vmem>>, vector<16x72xbf16>
    %cst_6 = arith.constant dense<0.000000e+00> : vector<32x72xf32>
    %9 = tpu.matmul %7, %8, %cst_6 {dimension_numbers = #tpu.dot_dimension_numbers<[1], [0], [0], [1], [0, 0, 1, 1], [], []>} : vector<32x16xbf16>, vector<16x72xbf16>, vector<32x72xf32> -> vector<32x72xf32>
    %10 = vector.extract_strided_slice %9 {offsets = [0, 0], sizes = [32, 64], strides = [1, 1]} : vector<32x72xf32> to vector<32x64xf32>
    %11 = vector.extract_strided_slice %9 {offsets = [0, 64], sizes = [32, 8], strides = [1, 1]} : vector<32x72xf32> to vector<32x8xf32>
    %c0_7 = arith.constant 0 : index
    %c0_8 = arith.constant 0 : index
    %12 = vector.load %arg4[%c0_7, %c0_8] : memref<8x16xbf16, #tpu.memory_space<vmem>>, vector<8x16xbf16>
    %cst_9 = arith.constant dense<0.000000e+00> : vector<8x32xf32>
    %13 = tpu.matmul %12, %7, %cst_9 {dimension_numbers = #tpu.dot_dimension_numbers<[1], [1], [0], [0], [0, 0, 1, 0], [], []>} : vector<8x16xbf16>, vector<32x16xbf16>, vector<8x32xf32> -> vector<8x32xf32>
    %14 = arith.truncf %10 : vector<32x64xf32> to vector<32x64xbf16>
    %15 = tpu.iota {dimensions = array<i32: 1>} : vector<1x64xi32>
    %cst_10 = arith.constant 0.000000e+00 : f32
    %16 = vector.broadcast %cst_10 : f32 to vector<32x64xf32>
    %17 = vector.extract_strided_slice %11 {offsets = [0, 0], sizes = [32, 1], strides = [1, 1]} : vector<32x8xf32> to vector<32x1xf32>
    %18 = vector.extract_strided_slice %13 {offsets = [0, 0], sizes = [1, 32], strides = [1, 1]} : vector<8x32xf32> to vector<1x32xf32>
    %19 = vector.broadcast %17 : vector<32x1xf32> to vector<32x32xf32>
    %20 = vector.broadcast %18 : vector<1x32xf32> to vector<32x32xf32>
    %21 = arith.addf %19, %20 : vector<32x32xf32>
    %cst_11 = arith.constant 0.000000e+00 : f32
    %22 = vector.broadcast %cst_11 : f32 to vector<32x32xf32>
    %23 = arith.cmpf ogt, %21, %22 : vector<32x32xf32>
    %cst_12 = arith.constant 2.000000e-01 : f32
    %24 = vector.broadcast %cst_12 : f32 to vector<32x32xf32>
    %25 = arith.mulf %24, %21 : vector<32x32xf32>
    %26 = arith.select %23, %21, %25 : vector<32x32xi1>, vector<32x32xf32>
    %27 = arith.addf %26, %5 : vector<32x32xf32>
    %cst_13 = arith.constant dense<0xFF800000> : vector<32xf32>
    %28 = vector.multi_reduction <maximumf>, %27, %cst_13 [1] : vector<32x32xf32> to vector<32xf32>
    %29 = vector.shape_cast %28 : vector<32xf32> to vector<32x1xf32>
    %30 = vector.broadcast %29 : vector<32x1xf32> to vector<32x32xf32>
    %31 = arith.subf %27, %30 : vector<32x32xf32>
    %32 = math.exp %31 : vector<32x32xf32>
    %cst_14 = arith.constant dense<0.000000e+00> : vector<32xf32>
    %33 = vector.multi_reduction <add>, %32, %cst_14 [1] : vector<32x32xf32> to vector<32xf32>
    %34 = vector.shape_cast %33 : vector<32xf32> to vector<32x1xf32>
    %35 = tpu.reciprocal %34 {approx = true} : vector<32x1xf32> -> vector<32x1xf32>
    %36 = vector.broadcast %35 : vector<32x1xf32> to vector<32x32xf32>
    %37 = arith.mulf %32, %36 : vector<32x32xf32>
    %c0_i32 = arith.constant 0 : i32
    %38 = vector.broadcast %c0_i32 : i32 to vector<1x64xi32>
    %39 = arith.cmpi sge, %15, %38 : vector<1x64xi32>
    %c8_i32 = arith.constant 8 : i32
    %40 = vector.broadcast %c8_i32 : i32 to vector<1x64xi32>
    %41 = arith.cmpi slt, %15, %40 : vector<1x64xi32>
    %42 = arith.andi %39, %41 : vector<1x64xi1>
    %43 = arith.extui %42 : vector<1x64xi1> to vector<1x64xi32>
    %44 = arith.sitofp %43 : vector<1x64xi32> to vector<1x64xf32>
    %45 = arith.truncf %44 : vector<1x64xf32> to vector<1x64xbf16>
    %46 = arith.truncf %37 : vector<32x32xf32> to vector<32x32xbf16>
    %47 = vector.broadcast %45 : vector<1x64xbf16> to vector<32x64xbf16>
    %48 = arith.mulf %14, %47 : vector<32x64xbf16>
    %cst_15 = arith.constant dense<0.000000e+00> : vector<32x64xf32>
    %49 = tpu.matmul %46, %48, %cst_15 {dimension_numbers = #tpu.dot_dimension_numbers<[1], [0], [0], [1], [0, 0, 1, 1], [], []>} : vector<32x32xbf16>, vector<32x64xbf16>, vector<32x64xf32> -> vector<32x64xf32>
    %50 = arith.addf %16, %49 : vector<32x64xf32>
    %51 = vector.extract_strided_slice %11 {offsets = [0, 1], sizes = [32, 1], strides = [1, 1]} : vector<32x8xf32> to vector<32x1xf32>
    %52 = vector.extract_strided_slice %13 {offsets = [1, 0], sizes = [1, 32], strides = [1, 1]} : vector<8x32xf32> to vector<1x32xf32>
    %53 = vector.broadcast %51 : vector<32x1xf32> to vector<32x32xf32>
    %54 = vector.broadcast %52 : vector<1x32xf32> to vector<32x32xf32>
    %55 = arith.addf %53, %54 : vector<32x32xf32>
    %cst_16 = arith.constant 0.000000e+00 : f32
    %56 = vector.broadcast %cst_16 : f32 to vector<32x32xf32>
    %57 = arith.cmpf ogt, %55, %56 : vector<32x32xf32>
    %cst_17 = arith.constant 2.000000e-01 : f32
    %58 = vector.broadcast %cst_17 : f32 to vector<32x32xf32>
    %59 = arith.mulf %58, %55 : vector<32x32xf32>
    %60 = arith.select %57, %55, %59 : vector<32x32xi1>, vector<32x32xf32>
    %61 = arith.addf %60, %5 : vector<32x32xf32>
    %cst_18 = arith.constant dense<0xFF800000> : vector<32xf32>
    %62 = vector.multi_reduction <maximumf>, %61, %cst_18 [1] : vector<32x32xf32> to vector<32xf32>
    %63 = vector.shape_cast %62 : vector<32xf32> to vector<32x1xf32>
    %64 = vector.broadcast %63 : vector<32x1xf32> to vector<32x32xf32>
    %65 = arith.subf %61, %64 : vector<32x32xf32>
    %66 = math.exp %65 : vector<32x32xf32>
    %cst_19 = arith.constant dense<0.000000e+00> : vector<32xf32>
    %67 = vector.multi_reduction <add>, %66, %cst_19 [1] : vector<32x32xf32> to vector<32xf32>
    %68 = vector.shape_cast %67 : vector<32xf32> to vector<32x1xf32>
    %69 = tpu.reciprocal %68 {approx = true} : vector<32x1xf32> -> vector<32x1xf32>
    %70 = vector.broadcast %69 : vector<32x1xf32> to vector<32x32xf32>
    %71 = arith.mulf %66, %70 : vector<32x32xf32>
    %c8_i32_20 = arith.constant 8 : i32
    %72 = vector.broadcast %c8_i32_20 : i32 to vector<1x64xi32>
    %73 = arith.cmpi sge, %15, %72 : vector<1x64xi32>
    %c16_i32 = arith.constant 16 : i32
    %74 = vector.broadcast %c16_i32 : i32 to vector<1x64xi32>
    %75 = arith.cmpi slt, %15, %74 : vector<1x64xi32>
    %76 = arith.andi %73, %75 : vector<1x64xi1>
    %77 = arith.extui %76 : vector<1x64xi1> to vector<1x64xi32>
    %78 = arith.sitofp %77 : vector<1x64xi32> to vector<1x64xf32>
    %79 = arith.truncf %78 : vector<1x64xf32> to vector<1x64xbf16>
    %80 = arith.truncf %71 : vector<32x32xf32> to vector<32x32xbf16>
    %81 = vector.broadcast %79 : vector<1x64xbf16> to vector<32x64xbf16>
    %82 = arith.mulf %14, %81 : vector<32x64xbf16>
    %cst_21 = arith.constant dense<0.000000e+00> : vector<32x64xf32>
    %83 = tpu.matmul %80, %82, %cst_21 {dimension_numbers = #tpu.dot_dimension_numbers<[1], [0], [0], [1], [0, 0, 1, 1], [], []>} : vector<32x32xbf16>, vector<32x64xbf16>, vector<32x64xf32> -> vector<32x64xf32>
    %84 = arith.addf %50, %83 : vector<32x64xf32>
    %85 = vector.extract_strided_slice %11 {offsets = [0, 2], sizes = [32, 1], strides = [1, 1]} : vector<32x8xf32> to vector<32x1xf32>
    %86 = vector.extract_strided_slice %13 {offsets = [2, 0], sizes = [1, 32], strides = [1, 1]} : vector<8x32xf32> to vector<1x32xf32>
    %87 = vector.broadcast %85 : vector<32x1xf32> to vector<32x32xf32>
    %88 = vector.broadcast %86 : vector<1x32xf32> to vector<32x32xf32>
    %89 = arith.addf %87, %88 : vector<32x32xf32>
    %cst_22 = arith.constant 0.000000e+00 : f32
    %90 = vector.broadcast %cst_22 : f32 to vector<32x32xf32>
    %91 = arith.cmpf ogt, %89, %90 : vector<32x32xf32>
    %cst_23 = arith.constant 2.000000e-01 : f32
    %92 = vector.broadcast %cst_23 : f32 to vector<32x32xf32>
    %93 = arith.mulf %92, %89 : vector<32x32xf32>
    %94 = arith.select %91, %89, %93 : vector<32x32xi1>, vector<32x32xf32>
    %95 = arith.addf %94, %5 : vector<32x32xf32>
    %cst_24 = arith.constant dense<0xFF800000> : vector<32xf32>
    %96 = vector.multi_reduction <maximumf>, %95, %cst_24 [1] : vector<32x32xf32> to vector<32xf32>
    %97 = vector.shape_cast %96 : vector<32xf32> to vector<32x1xf32>
    %98 = vector.broadcast %97 : vector<32x1xf32> to vector<32x32xf32>
    %99 = arith.subf %95, %98 : vector<32x32xf32>
    %100 = math.exp %99 : vector<32x32xf32>
    %cst_25 = arith.constant dense<0.000000e+00> : vector<32xf32>
    %101 = vector.multi_reduction <add>, %100, %cst_25 [1] : vector<32x32xf32> to vector<32xf32>
    %102 = vector.shape_cast %101 : vector<32xf32> to vector<32x1xf32>
    %103 = tpu.reciprocal %102 {approx = true} : vector<32x1xf32> -> vector<32x1xf32>
    %104 = vector.broadcast %103 : vector<32x1xf32> to vector<32x32xf32>
    %105 = arith.mulf %100, %104 : vector<32x32xf32>
    %c16_i32_26 = arith.constant 16 : i32
    %106 = vector.broadcast %c16_i32_26 : i32 to vector<1x64xi32>
    %107 = arith.cmpi sge, %15, %106 : vector<1x64xi32>
    %c24_i32 = arith.constant 24 : i32
    %108 = vector.broadcast %c24_i32 : i32 to vector<1x64xi32>
    %109 = arith.cmpi slt, %15, %108 : vector<1x64xi32>
    %110 = arith.andi %107, %109 : vector<1x64xi1>
    %111 = arith.extui %110 : vector<1x64xi1> to vector<1x64xi32>
    %112 = arith.sitofp %111 : vector<1x64xi32> to vector<1x64xf32>
    %113 = arith.truncf %112 : vector<1x64xf32> to vector<1x64xbf16>
    %114 = arith.truncf %105 : vector<32x32xf32> to vector<32x32xbf16>
    %115 = vector.broadcast %113 : vector<1x64xbf16> to vector<32x64xbf16>
    %116 = arith.mulf %14, %115 : vector<32x64xbf16>
    %cst_27 = arith.constant dense<0.000000e+00> : vector<32x64xf32>
    %117 = tpu.matmul %114, %116, %cst_27 {dimension_numbers = #tpu.dot_dimension_numbers<[1], [0], [0], [1], [0, 0, 1, 1], [], []>} : vector<32x32xbf16>, vector<32x64xbf16>, vector<32x64xf32> -> vector<32x64xf32>
    %118 = arith.addf %84, %117 : vector<32x64xf32>
    %119 = vector.extract_strided_slice %11 {offsets = [0, 3], sizes = [32, 1], strides = [1, 1]} : vector<32x8xf32> to vector<32x1xf32>
    %120 = vector.extract_strided_slice %13 {offsets = [3, 0], sizes = [1, 32], strides = [1, 1]} : vector<8x32xf32> to vector<1x32xf32>
    %121 = vector.broadcast %119 : vector<32x1xf32> to vector<32x32xf32>
    %122 = vector.broadcast %120 : vector<1x32xf32> to vector<32x32xf32>
    %123 = arith.addf %121, %122 : vector<32x32xf32>
    %cst_28 = arith.constant 0.000000e+00 : f32
    %124 = vector.broadcast %cst_28 : f32 to vector<32x32xf32>
    %125 = arith.cmpf ogt, %123, %124 : vector<32x32xf32>
    %cst_29 = arith.constant 2.000000e-01 : f32
    %126 = vector.broadcast %cst_29 : f32 to vector<32x32xf32>
    %127 = arith.mulf %126, %123 : vector<32x32xf32>
    %128 = arith.select %125, %123, %127 : vector<32x32xi1>, vector<32x32xf32>
    %129 = arith.addf %128, %5 : vector<32x32xf32>
    %cst_30 = arith.constant dense<0xFF800000> : vector<32xf32>
    %130 = vector.multi_reduction <maximumf>, %129, %cst_30 [1] : vector<32x32xf32> to vector<32xf32>
    %131 = vector.shape_cast %130 : vector<32xf32> to vector<32x1xf32>
    %132 = vector.broadcast %131 : vector<32x1xf32> to vector<32x32xf32>
    %133 = arith.subf %129, %132 : vector<32x32xf32>
    %134 = math.exp %133 : vector<32x32xf32>
    %cst_31 = arith.constant dense<0.000000e+00> : vector<32xf32>
    %135 = vector.multi_reduction <add>, %134, %cst_31 [1] : vector<32x32xf32> to vector<32xf32>
    %136 = vector.shape_cast %135 : vector<32xf32> to vector<32x1xf32>
    %137 = tpu.reciprocal %136 {approx = true} : vector<32x1xf32> -> vector<32x1xf32>
    %138 = vector.broadcast %137 : vector<32x1xf32> to vector<32x32xf32>
    %139 = arith.mulf %134, %138 : vector<32x32xf32>
    %c24_i32_32 = arith.constant 24 : i32
    %140 = vector.broadcast %c24_i32_32 : i32 to vector<1x64xi32>
    %141 = arith.cmpi sge, %15, %140 : vector<1x64xi32>
    %c32_i32 = arith.constant 32 : i32
    %142 = vector.broadcast %c32_i32 : i32 to vector<1x64xi32>
    %143 = arith.cmpi slt, %15, %142 : vector<1x64xi32>
    %144 = arith.andi %141, %143 : vector<1x64xi1>
    %145 = arith.extui %144 : vector<1x64xi1> to vector<1x64xi32>
    %146 = arith.sitofp %145 : vector<1x64xi32> to vector<1x64xf32>
    %147 = arith.truncf %146 : vector<1x64xf32> to vector<1x64xbf16>
    %148 = arith.truncf %139 : vector<32x32xf32> to vector<32x32xbf16>
    %149 = vector.broadcast %147 : vector<1x64xbf16> to vector<32x64xbf16>
    %150 = arith.mulf %14, %149 : vector<32x64xbf16>
    %cst_33 = arith.constant dense<0.000000e+00> : vector<32x64xf32>
    %151 = tpu.matmul %148, %150, %cst_33 {dimension_numbers = #tpu.dot_dimension_numbers<[1], [0], [0], [1], [0, 0, 1, 1], [], []>} : vector<32x32xbf16>, vector<32x64xbf16>, vector<32x64xf32> -> vector<32x64xf32>
    %152 = arith.addf %118, %151 : vector<32x64xf32>
    %153 = vector.extract_strided_slice %11 {offsets = [0, 4], sizes = [32, 1], strides = [1, 1]} : vector<32x8xf32> to vector<32x1xf32>
    %154 = vector.extract_strided_slice %13 {offsets = [4, 0], sizes = [1, 32], strides = [1, 1]} : vector<8x32xf32> to vector<1x32xf32>
    %155 = vector.broadcast %153 : vector<32x1xf32> to vector<32x32xf32>
    %156 = vector.broadcast %154 : vector<1x32xf32> to vector<32x32xf32>
    %157 = arith.addf %155, %156 : vector<32x32xf32>
    %cst_34 = arith.constant 0.000000e+00 : f32
    %158 = vector.broadcast %cst_34 : f32 to vector<32x32xf32>
    %159 = arith.cmpf ogt, %157, %158 : vector<32x32xf32>
    %cst_35 = arith.constant 2.000000e-01 : f32
    %160 = vector.broadcast %cst_35 : f32 to vector<32x32xf32>
    %161 = arith.mulf %160, %157 : vector<32x32xf32>
    %162 = arith.select %159, %157, %161 : vector<32x32xi1>, vector<32x32xf32>
    %163 = arith.addf %162, %5 : vector<32x32xf32>
    %cst_36 = arith.constant dense<0xFF800000> : vector<32xf32>
    %164 = vector.multi_reduction <maximumf>, %163, %cst_36 [1] : vector<32x32xf32> to vector<32xf32>
    %165 = vector.shape_cast %164 : vector<32xf32> to vector<32x1xf32>
    %166 = vector.broadcast %165 : vector<32x1xf32> to vector<32x32xf32>
    %167 = arith.subf %163, %166 : vector<32x32xf32>
    %168 = math.exp %167 : vector<32x32xf32>
    %cst_37 = arith.constant dense<0.000000e+00> : vector<32xf32>
    %169 = vector.multi_reduction <add>, %168, %cst_37 [1] : vector<32x32xf32> to vector<32xf32>
    %170 = vector.shape_cast %169 : vector<32xf32> to vector<32x1xf32>
    %171 = tpu.reciprocal %170 {approx = true} : vector<32x1xf32> -> vector<32x1xf32>
    %172 = vector.broadcast %171 : vector<32x1xf32> to vector<32x32xf32>
    %173 = arith.mulf %168, %172 : vector<32x32xf32>
    %c32_i32_38 = arith.constant 32 : i32
    %174 = vector.broadcast %c32_i32_38 : i32 to vector<1x64xi32>
    %175 = arith.cmpi sge, %15, %174 : vector<1x64xi32>
    %c40_i32 = arith.constant 40 : i32
    %176 = vector.broadcast %c40_i32 : i32 to vector<1x64xi32>
    %177 = arith.cmpi slt, %15, %176 : vector<1x64xi32>
    %178 = arith.andi %175, %177 : vector<1x64xi1>
    %179 = arith.extui %178 : vector<1x64xi1> to vector<1x64xi32>
    %180 = arith.sitofp %179 : vector<1x64xi32> to vector<1x64xf32>
    %181 = arith.truncf %180 : vector<1x64xf32> to vector<1x64xbf16>
    %182 = arith.truncf %173 : vector<32x32xf32> to vector<32x32xbf16>
    %183 = vector.broadcast %181 : vector<1x64xbf16> to vector<32x64xbf16>
    %184 = arith.mulf %14, %183 : vector<32x64xbf16>
    %cst_39 = arith.constant dense<0.000000e+00> : vector<32x64xf32>
    %185 = tpu.matmul %182, %184, %cst_39 {dimension_numbers = #tpu.dot_dimension_numbers<[1], [0], [0], [1], [0, 0, 1, 1], [], []>} : vector<32x32xbf16>, vector<32x64xbf16>, vector<32x64xf32> -> vector<32x64xf32>
    %186 = arith.addf %152, %185 : vector<32x64xf32>
    %187 = vector.extract_strided_slice %11 {offsets = [0, 5], sizes = [32, 1], strides = [1, 1]} : vector<32x8xf32> to vector<32x1xf32>
    %188 = vector.extract_strided_slice %13 {offsets = [5, 0], sizes = [1, 32], strides = [1, 1]} : vector<8x32xf32> to vector<1x32xf32>
    %189 = vector.broadcast %187 : vector<32x1xf32> to vector<32x32xf32>
    %190 = vector.broadcast %188 : vector<1x32xf32> to vector<32x32xf32>
    %191 = arith.addf %189, %190 : vector<32x32xf32>
    %cst_40 = arith.constant 0.000000e+00 : f32
    %192 = vector.broadcast %cst_40 : f32 to vector<32x32xf32>
    %193 = arith.cmpf ogt, %191, %192 : vector<32x32xf32>
    %cst_41 = arith.constant 2.000000e-01 : f32
    %194 = vector.broadcast %cst_41 : f32 to vector<32x32xf32>
    %195 = arith.mulf %194, %191 : vector<32x32xf32>
    %196 = arith.select %193, %191, %195 : vector<32x32xi1>, vector<32x32xf32>
    %197 = arith.addf %196, %5 : vector<32x32xf32>
    %cst_42 = arith.constant dense<0xFF800000> : vector<32xf32>
    %198 = vector.multi_reduction <maximumf>, %197, %cst_42 [1] : vector<32x32xf32> to vector<32xf32>
    %199 = vector.shape_cast %198 : vector<32xf32> to vector<32x1xf32>
    %200 = vector.broadcast %199 : vector<32x1xf32> to vector<32x32xf32>
    %201 = arith.subf %197, %200 : vector<32x32xf32>
    %202 = math.exp %201 : vector<32x32xf32>
    %cst_43 = arith.constant dense<0.000000e+00> : vector<32xf32>
    %203 = vector.multi_reduction <add>, %202, %cst_43 [1] : vector<32x32xf32> to vector<32xf32>
    %204 = vector.shape_cast %203 : vector<32xf32> to vector<32x1xf32>
    %205 = tpu.reciprocal %204 {approx = true} : vector<32x1xf32> -> vector<32x1xf32>
    %206 = vector.broadcast %205 : vector<32x1xf32> to vector<32x32xf32>
    %207 = arith.mulf %202, %206 : vector<32x32xf32>
    %c40_i32_44 = arith.constant 40 : i32
    %208 = vector.broadcast %c40_i32_44 : i32 to vector<1x64xi32>
    %209 = arith.cmpi sge, %15, %208 : vector<1x64xi32>
    %c48_i32 = arith.constant 48 : i32
    %210 = vector.broadcast %c48_i32 : i32 to vector<1x64xi32>
    %211 = arith.cmpi slt, %15, %210 : vector<1x64xi32>
    %212 = arith.andi %209, %211 : vector<1x64xi1>
    %213 = arith.extui %212 : vector<1x64xi1> to vector<1x64xi32>
    %214 = arith.sitofp %213 : vector<1x64xi32> to vector<1x64xf32>
    %215 = arith.truncf %214 : vector<1x64xf32> to vector<1x64xbf16>
    %216 = arith.truncf %207 : vector<32x32xf32> to vector<32x32xbf16>
    %217 = vector.broadcast %215 : vector<1x64xbf16> to vector<32x64xbf16>
    %218 = arith.mulf %14, %217 : vector<32x64xbf16>
    %cst_45 = arith.constant dense<0.000000e+00> : vector<32x64xf32>
    %219 = tpu.matmul %216, %218, %cst_45 {dimension_numbers = #tpu.dot_dimension_numbers<[1], [0], [0], [1], [0, 0, 1, 1], [], []>} : vector<32x32xbf16>, vector<32x64xbf16>, vector<32x64xf32> -> vector<32x64xf32>
    %220 = arith.addf %186, %219 : vector<32x64xf32>
    %221 = vector.extract_strided_slice %11 {offsets = [0, 6], sizes = [32, 1], strides = [1, 1]} : vector<32x8xf32> to vector<32x1xf32>
    %222 = vector.extract_strided_slice %13 {offsets = [6, 0], sizes = [1, 32], strides = [1, 1]} : vector<8x32xf32> to vector<1x32xf32>
    %223 = vector.broadcast %221 : vector<32x1xf32> to vector<32x32xf32>
    %224 = vector.broadcast %222 : vector<1x32xf32> to vector<32x32xf32>
    %225 = arith.addf %223, %224 : vector<32x32xf32>
    %cst_46 = arith.constant 0.000000e+00 : f32
    %226 = vector.broadcast %cst_46 : f32 to vector<32x32xf32>
    %227 = arith.cmpf ogt, %225, %226 : vector<32x32xf32>
    %cst_47 = arith.constant 2.000000e-01 : f32
    %228 = vector.broadcast %cst_47 : f32 to vector<32x32xf32>
    %229 = arith.mulf %228, %225 : vector<32x32xf32>
    %230 = arith.select %227, %225, %229 : vector<32x32xi1>, vector<32x32xf32>
    %231 = arith.addf %230, %5 : vector<32x32xf32>
    %cst_48 = arith.constant dense<0xFF800000> : vector<32xf32>
    %232 = vector.multi_reduction <maximumf>, %231, %cst_48 [1] : vector<32x32xf32> to vector<32xf32>
    %233 = vector.shape_cast %232 : vector<32xf32> to vector<32x1xf32>
    %234 = vector.broadcast %233 : vector<32x1xf32> to vector<32x32xf32>
    %235 = arith.subf %231, %234 : vector<32x32xf32>
    %236 = math.exp %235 : vector<32x32xf32>
    %cst_49 = arith.constant dense<0.000000e+00> : vector<32xf32>
    %237 = vector.multi_reduction <add>, %236, %cst_49 [1] : vector<32x32xf32> to vector<32xf32>
    %238 = vector.shape_cast %237 : vector<32xf32> to vector<32x1xf32>
    %239 = tpu.reciprocal %238 {approx = true} : vector<32x1xf32> -> vector<32x1xf32>
    %240 = vector.broadcast %239 : vector<32x1xf32> to vector<32x32xf32>
    %241 = arith.mulf %236, %240 : vector<32x32xf32>
    %c48_i32_50 = arith.constant 48 : i32
    %242 = vector.broadcast %c48_i32_50 : i32 to vector<1x64xi32>
    %243 = arith.cmpi sge, %15, %242 : vector<1x64xi32>
    %c56_i32 = arith.constant 56 : i32
    %244 = vector.broadcast %c56_i32 : i32 to vector<1x64xi32>
    %245 = arith.cmpi slt, %15, %244 : vector<1x64xi32>
    %246 = arith.andi %243, %245 : vector<1x64xi1>
    %247 = arith.extui %246 : vector<1x64xi1> to vector<1x64xi32>
    %248 = arith.sitofp %247 : vector<1x64xi32> to vector<1x64xf32>
    %249 = arith.truncf %248 : vector<1x64xf32> to vector<1x64xbf16>
    %250 = arith.truncf %241 : vector<32x32xf32> to vector<32x32xbf16>
    %251 = vector.broadcast %249 : vector<1x64xbf16> to vector<32x64xbf16>
    %252 = arith.mulf %14, %251 : vector<32x64xbf16>
    %cst_51 = arith.constant dense<0.000000e+00> : vector<32x64xf32>
    %253 = tpu.matmul %250, %252, %cst_51 {dimension_numbers = #tpu.dot_dimension_numbers<[1], [0], [0], [1], [0, 0, 1, 1], [], []>} : vector<32x32xbf16>, vector<32x64xbf16>, vector<32x64xf32> -> vector<32x64xf32>
    %254 = arith.addf %220, %253 : vector<32x64xf32>
    %255 = vector.extract_strided_slice %11 {offsets = [0, 7], sizes = [32, 1], strides = [1, 1]} : vector<32x8xf32> to vector<32x1xf32>
    %256 = vector.extract_strided_slice %13 {offsets = [7, 0], sizes = [1, 32], strides = [1, 1]} : vector<8x32xf32> to vector<1x32xf32>
    %257 = vector.broadcast %255 : vector<32x1xf32> to vector<32x32xf32>
    %258 = vector.broadcast %256 : vector<1x32xf32> to vector<32x32xf32>
    %259 = arith.addf %257, %258 : vector<32x32xf32>
    %cst_52 = arith.constant 0.000000e+00 : f32
    %260 = vector.broadcast %cst_52 : f32 to vector<32x32xf32>
    %261 = arith.cmpf ogt, %259, %260 : vector<32x32xf32>
    %cst_53 = arith.constant 2.000000e-01 : f32
    %262 = vector.broadcast %cst_53 : f32 to vector<32x32xf32>
    %263 = arith.mulf %262, %259 : vector<32x32xf32>
    %264 = arith.select %261, %259, %263 : vector<32x32xi1>, vector<32x32xf32>
    %265 = arith.addf %264, %5 : vector<32x32xf32>
    %cst_54 = arith.constant dense<0xFF800000> : vector<32xf32>
    %266 = vector.multi_reduction <maximumf>, %265, %cst_54 [1] : vector<32x32xf32> to vector<32xf32>
    %267 = vector.shape_cast %266 : vector<32xf32> to vector<32x1xf32>
    %268 = vector.broadcast %267 : vector<32x1xf32> to vector<32x32xf32>
    %269 = arith.subf %265, %268 : vector<32x32xf32>
    %270 = math.exp %269 : vector<32x32xf32>
    %cst_55 = arith.constant dense<0.000000e+00> : vector<32xf32>
    %271 = vector.multi_reduction <add>, %270, %cst_55 [1] : vector<32x32xf32> to vector<32xf32>
    %272 = vector.shape_cast %271 : vector<32xf32> to vector<32x1xf32>
    %273 = tpu.reciprocal %272 {approx = true} : vector<32x1xf32> -> vector<32x1xf32>
    %274 = vector.broadcast %273 : vector<32x1xf32> to vector<32x32xf32>
    %275 = arith.mulf %270, %274 : vector<32x32xf32>
    %c56_i32_56 = arith.constant 56 : i32
    %276 = vector.broadcast %c56_i32_56 : i32 to vector<1x64xi32>
    %277 = arith.cmpi sge, %15, %276 : vector<1x64xi32>
    %c64_i32 = arith.constant 64 : i32
    %278 = vector.broadcast %c64_i32 : i32 to vector<1x64xi32>
    %279 = arith.cmpi slt, %15, %278 : vector<1x64xi32>
    %280 = arith.andi %277, %279 : vector<1x64xi1>
    %281 = arith.extui %280 : vector<1x64xi1> to vector<1x64xi32>
    %282 = arith.sitofp %281 : vector<1x64xi32> to vector<1x64xf32>
    %283 = arith.truncf %282 : vector<1x64xf32> to vector<1x64xbf16>
    %284 = arith.truncf %275 : vector<32x32xf32> to vector<32x32xbf16>
    %285 = vector.broadcast %283 : vector<1x64xbf16> to vector<32x64xbf16>
    %286 = arith.mulf %14, %285 : vector<32x64xbf16>
    %cst_57 = arith.constant dense<0.000000e+00> : vector<32x64xf32>
    %287 = tpu.matmul %284, %286, %cst_57 {dimension_numbers = #tpu.dot_dimension_numbers<[1], [0], [0], [1], [0, 0, 1, 1], [], []>} : vector<32x32xbf16>, vector<32x64xbf16>, vector<32x64xf32> -> vector<32x64xf32>
    %288 = arith.addf %254, %287 : vector<32x64xf32>
    %c0_58 = arith.constant 0 : index
    %c0_59 = arith.constant 0 : index
    %289 = vector.load %arg5[%c0_58, %c0_59] : memref<1x64xf32, #tpu.memory_space<vmem>>, vector<1x64xf32>
    %290 = vector.broadcast %289 : vector<1x64xf32> to vector<32x64xf32>
    %291 = arith.addf %288, %290 : vector<32x64xf32>
    %cst_60 = arith.constant 0.000000e+00 : f32
    %292 = vector.broadcast %cst_60 : f32 to vector<32x64xf32>
    %293 = arith.cmpf ogt, %291, %292 : vector<32x64xf32>
    %cst_61 = arith.constant 0.000000e+00 : f32
    %294 = vector.broadcast %cst_61 : f32 to vector<32x64xf32>
    %295 = arith.minimumf %291, %294 : vector<32x64xf32>
    %296 = math.exp %295 : vector<32x64xf32>
    %cst_62 = arith.constant 1.000000e+00 : f32
    %297 = vector.broadcast %cst_62 : f32 to vector<32x64xf32>
    %298 = arith.subf %296, %297 : vector<32x64xf32>
    %299 = arith.select %293, %291, %298 : vector<32x64xi1>, vector<32x64xf32>
    %300 = arith.truncf %299 : vector<32x64xf32> to vector<32x64xbf16>
    %c0_63 = arith.constant 0 : index
    %c0_64 = arith.constant 0 : index
    %301 = vector.load %arg6[%c0_63, %c0_64] : memref<64x5xbf16, #tpu.memory_space<vmem>>, vector<64x5xbf16>
    %cst_65 = arith.constant dense<0.000000e+00> : vector<32x5xf32>
    %302 = tpu.matmul %300, %301, %cst_65 {dimension_numbers = #tpu.dot_dimension_numbers<[1], [0], [0], [1], [0, 0, 1, 1], [], []>} : vector<32x64xbf16>, vector<64x5xbf16>, vector<32x5xf32> -> vector<32x5xf32>
    %303 = vector.extract_strided_slice %302 {offsets = [0, 0], sizes = [32, 4], strides = [1, 1]} : vector<32x5xf32> to vector<32x4xf32>
    %304 = vector.extract_strided_slice %302 {offsets = [0, 4], sizes = [32, 1], strides = [1, 1]} : vector<32x5xf32> to vector<32x1xf32>
    %c0_66 = arith.constant 0 : index
    %c0_67 = arith.constant 0 : index
    %305 = vector.load %arg7[%c0_66, %c0_67] : memref<1x64xbf16, #tpu.memory_space<vmem>>, vector<1x64xbf16>
    %cst_68 = arith.constant dense<0.000000e+00> : vector<1x32xf32>
    %306 = tpu.matmul %305, %300, %cst_68 {dimension_numbers = #tpu.dot_dimension_numbers<[1], [1], [0], [0], [0, 0, 1, 0], [], []>} : vector<1x64xbf16>, vector<32x64xbf16>, vector<1x32xf32> -> vector<1x32xf32>
    %307 = vector.broadcast %304 : vector<32x1xf32> to vector<32x32xf32>
    %308 = vector.broadcast %306 : vector<1x32xf32> to vector<32x32xf32>
    %309 = arith.addf %307, %308 : vector<32x32xf32>
    %cst_69 = arith.constant 0.000000e+00 : f32
    %310 = vector.broadcast %cst_69 : f32 to vector<32x32xf32>
    %311 = arith.cmpf ogt, %309, %310 : vector<32x32xf32>
    %cst_70 = arith.constant 2.000000e-01 : f32
    %312 = vector.broadcast %cst_70 : f32 to vector<32x32xf32>
    %313 = arith.mulf %312, %309 : vector<32x32xf32>
    %314 = arith.select %311, %309, %313 : vector<32x32xi1>, vector<32x32xf32>
    %315 = arith.addf %314, %5 : vector<32x32xf32>
    %cst_71 = arith.constant dense<0xFF800000> : vector<32xf32>
    %316 = vector.multi_reduction <maximumf>, %315, %cst_71 [1] : vector<32x32xf32> to vector<32xf32>
    %317 = vector.shape_cast %316 : vector<32xf32> to vector<32x1xf32>
    %318 = vector.broadcast %317 : vector<32x1xf32> to vector<32x32xf32>
    %319 = arith.subf %315, %318 : vector<32x32xf32>
    %320 = math.exp %319 : vector<32x32xf32>
    %cst_72 = arith.constant dense<0.000000e+00> : vector<32xf32>
    %321 = vector.multi_reduction <add>, %320, %cst_72 [1] : vector<32x32xf32> to vector<32xf32>
    %322 = vector.shape_cast %321 : vector<32xf32> to vector<32x1xf32>
    %323 = tpu.reciprocal %322 {approx = true} : vector<32x1xf32> -> vector<32x1xf32>
    %324 = vector.broadcast %323 : vector<32x1xf32> to vector<32x32xf32>
    %325 = arith.mulf %320, %324 : vector<32x32xf32>
    %cst_73 = arith.constant dense<0.000000e+00> : vector<32x4xf32>
    %326 = tpu.matmul %325, %303, %cst_73 {dimension_numbers = #tpu.dot_dimension_numbers<[1], [0], [0], [1], [0, 0, 1, 1], [], []>} : vector<32x32xf32>, vector<32x4xf32>, vector<32x4xf32> -> vector<32x4xf32>
    %c0_74 = arith.constant 0 : index
    %c0_75 = arith.constant 0 : index
    %327 = vector.load %arg8[%c0_74, %c0_75] : memref<1x4xf32, #tpu.memory_space<vmem>>, vector<1x4xf32>
    %328 = vector.broadcast %327 : vector<1x4xf32> to vector<32x4xf32>
    %329 = arith.addf %326, %328 : vector<32x4xf32>
    %cst_76 = arith.constant dense<0xFF800000> : vector<32xf32>
    %330 = vector.multi_reduction <maximumf>, %329, %cst_76 [1] : vector<32x4xf32> to vector<32xf32>
    %331 = vector.shape_cast %330 : vector<32xf32> to vector<32x1xf32>
    %332 = vector.broadcast %331 : vector<32x1xf32> to vector<32x4xf32>
    %333 = arith.subf %329, %332 : vector<32x4xf32>
    %334 = math.exp %333 : vector<32x4xf32>
    %cst_77 = arith.constant dense<0.000000e+00> : vector<32xf32>
    %335 = vector.multi_reduction <add>, %334, %cst_77 [1] : vector<32x4xf32> to vector<32xf32>
    %336 = vector.shape_cast %335 : vector<32xf32> to vector<32x1xf32>
    %337 = math.log %336 : vector<32x1xf32>
    %338 = arith.addf %337, %331 : vector<32x1xf32>
    %339 = vector.broadcast %338 : vector<32x1xf32> to vector<32x4xf32>
    %340 = arith.subf %329, %339 : vector<32x4xf32>
    %cst_78 = arith.constant 0.000000e+00 : f32
    %341 = vector.broadcast %cst_78 : f32 to vector<32x128xf32>
    %c0_79 = arith.constant 0 : index
    %c0_80 = arith.constant 0 : index
    %342 = vector.load %arg9[%c0_79, %c0_80] : memref<32x128xf32, #tpu.memory_space<vmem>>, vector<32x128xf32>
    tpu.vector_store %arg9[%c0_79, %c0_80], %341 {strides = array<i32>} : memref<32x128xf32, #tpu.memory_space<vmem>>, vector<32x128xf32>,
    %c0_81 = arith.constant 0 : index
    %c0_82 = arith.constant 0 : index
    %343 = vector.load %arg9[%c0_81, %c0_82] : memref<32x128xf32, #tpu.memory_space<vmem>>, vector<32x64xf32>
    tpu.vector_store %arg9[%c0_81, %c0_82], %291 {strides = array<i32>} : memref<32x128xf32, #tpu.memory_space<vmem>>, vector<32x64xf32>,
    %c0_83 = arith.constant 0 : index
    %c64 = arith.constant 64 : index
    %344 = vector.load %arg9[%c0_83, %c64] : memref<32x128xf32, #tpu.memory_space<vmem>>, vector<32x4xf32>
    tpu.vector_store %arg9[%c0_83, %c64], %340 {strides = array<i32>} : memref<32x128xf32, #tpu.memory_space<vmem>>, vector<32x4xf32>,
    return
  }
  func.func @transform_0(%arg0: i32) -> (i32, i32) {
    %c0_i32 = arith.constant 0 : i32
    %c0_i32_0 = arith.constant 0 : i32
    %c0_i32_1 = arith.constant 0 : i32
    return %c0_i32, %c0_i32_0 : i32, i32
  }
  func.func @transform_1(%arg0: i32) -> (i32, i32) {
    %c0_i32 = arith.constant 0 : i32
    %c0_i32_0 = arith.constant 0 : i32
    %c0_i32_1 = arith.constant 0 : i32
    return %c0_i32, %c0_i32_0 : i32, i32
  }
  func.func @transform_2(%arg0: i32) -> (i32, i32) {
    %c0_i32 = arith.constant 0 : i32
    %c0_i32_0 = arith.constant 0 : i32
    %c0_i32_1 = arith.constant 0 : i32
    return %c0_i32, %c0_i32_0 : i32, i32
  }
  func.func @transform_3(%arg0: i32) -> (i32, i32) {
    %c0_i32 = arith.constant 0 : i32
    %c0_i32_0 = arith.constant 0 : i32
    %c0_i32_1 = arith.constant 0 : i32
    return %c0_i32, %c0_i32_0 : i32, i32
  }
  func.func @transform_4(%arg0: i32) -> (i32, i32) {
    %c0_i32 = arith.constant 0 : i32
    %c0_i32_0 = arith.constant 0 : i32
    %c0_i32_1 = arith.constant 0 : i32
    return %c0_i32, %c0_i32_0 : i32, i32
  }
  func.func @transform_5(%arg0: i32) -> (i32, i32) {
    %c0_i32 = arith.constant 0 : i32
    %c0_i32_0 = arith.constant 0 : i32
    %c0_i32_1 = arith.constant 0 : i32
    return %c0_i32, %c0_i32_0 : i32, i32
  }
  func.func @transform_6(%arg0: i32) -> (i32, i32) {
    %c0_i32 = arith.constant 0 : i32
    %c0_i32_0 = arith.constant 0 : i32
    %c0_i32_1 = arith.constant 0 : i32
    return %c0_i32, %c0_i32_0 : i32, i32
  }
  func.func @transform_7(%arg0: i32) -> (i32, i32) {
    %c0_i32 = arith.constant 0 : i32
    %c0_i32_0 = arith.constant 0 : i32
    %c0_i32_1 = arith.constant 0 : i32
    return %c0_i32, %c0_i32_0 : i32, i32
  }
  func.func @transform_8(%arg0: i32) -> (i32, i32) {
    %c0_i32 = arith.constant 0 : i32
    %c0_i32_0 = arith.constant 0 : i32
    %c0_i32_1 = arith.constant 0 : i32
    return %c0_i32, %c0_i32_0 : i32, i32
  }
}

</mosaic_0001>

<bundles_post_ra>
// kernel: gat_forward.1
= control target key start
LH: loop header
LB: loop body
LE: loop exit
PB: predicated region body
PF: predicated region fallthrough
CT: control target
= control target key end

     0   :  { %v2312_v1 = vmov 65   ;;  %vm60_vm0 = vcmask 130048   ;;  %v3136_v8 = vmov 0.0   ;;  %vm3134_vm1 = vmmov 0   ;;  %s3125_s2 = inlined_call_operand.vmem [shape: bf16[16,72], index: 2, kind: input, shape index: {}]   ;;  %s3126_s0 = inlined_call_operand.vmem [shape: f32[32,16], index: 0, kind: input, shape index: {}]   ;;  %s3127_s3 = inlined_call_operand.vmem [shape: bf16[8,16], index: 3, kind: input, shape index: {}]   ;;  %s3128_s1 = inlined_call_operand.vmem [shape: bf16[32,32], index: 1, kind: input, shape index: {}]   ;;  %s3129_s8 = inlined_call_operand.vmem [shape: f32[32,128], index: 8, kind: output, shape index: {}]   ;;  %s3130_s5 = inlined_call_operand.vmem [shape: bf16[64,5], index: 5, kind: input, shape index: {}]   ;;  %s3131_s4 = inlined_call_operand.vmem [shape: f32[1,64], index: 4, kind: input, shape index: {}]   ;;  %s3132_s6 = inlined_call_operand.vmem [shape: bf16[1,64], index: 6, kind: input, shape index: {}]   ;;  %s3133_s7 = inlined_call_operand.vmem [shape: f32[1,4], index: 7, kind: input, shape index: {}]  }
   0x1   :  { %v2139_v0 = vld [vmem:[%s3125_s2] sm:$0xff]   ;;  %2105 = vset.pattern.permute.xlu1 %v2312_v1  ;;  %2113 = vset.pattern.permute.xlu0 %v2312_v1  ;;  %v47_v3 = vld [vmem:[%s3126_s0 + $0x8] sm:$0xff]  ;;  %v48_v4 = vld [vmem:[%s3126_s0 + $0x10] sm:$0xff]  ;;  %v162_v12 = vlaneseq  ;;  %v3140_v14 = vmov 0  ;;  %v2315_v36 = vmov 64   ;;  %v2316_v53 = vmov 66  }
   0x2   :  { %v46_v2 = vld [vmem:[%s3126_s0] sm:$0xff]  ;;  %1945 = vmatprep.subr.bf16.mxu1 %v2139_v0  ;;  %v49_v6 = vld [vmem:[%s3126_s0 + $0x18] sm:$0xff]  ;;  %v2317_v54 = vmov 67   ;;  %v2318_v57 = vmov 69  }
   0x3   :  { %v50_v5 = vpack.c.bf16 %v47_v3, %v46_v2  ;;  %1946 = vmatpush3.bf16.msra.mxu1 %v2139_v0  ;;  %v51_v7 = vpack.c.bf16 %v49_v6, %v48_v4  ;;  %v116_v11 = vld [vmem:[%s3127_s3] sm:$0xf]  ;;  %v163_v13 = vand.u32 127, %v162_v12  ;;  %v2465_v56 = vshrl.u32 %v162_v12, 7 }
   0x4   :  { %1951 = vmatprep.subr.bf16.mxu1 %v3136_v8  ;;  %v2319_v0 = vmov 68  }
   0x5   :  { %1947 = vmatprep.mubr.msk.bf16.mxu1 %vm60_vm0, %v50_v5  ;;  %v62_v9 = vsel %vm60_vm0, %v50_v5, 0  ;;  %v65_v10 = vsel %vm60_vm0, %v51_v7, 0  ;;  %vm347_vm2 = vcmp.ge.s32.totalorder %v163_v13, 8  ;;  %vm348_vm3 = vcmp.lt.s32.totalorder %v163_v13, 16  ;;  %3143 = vst [vmem:[#allocation2_spill] sm:$0xff] %v2465_v56 }
   0x6   :  { %1948 = vmatmul.mubr.msk.bf16.vlgmr.msra.gmra.mrb[0].mxu1 %vm60_vm0, %v51_v7  ;;  %vm551_vm4 = vcmp.ge.s32.totalorder %v163_v13, 16  ;;  %vm552_vm5 = vcmp.lt.s32.totalorder %v163_v13, 24  ;;  %vm704_vm6 = vcmp.ge.s32.totalorder %v163_v13, 24  ;;  %vm705_vm7 = vcmp.lt.s32.totalorder %v163_v13, 32  ;;  %vm2399_vm8 = vmand %vm347_vm2, %vm348_vm3 }
   0x7   :  { %1955 = vmatprep.mubr.msk.bf16.mxu1 %vm3134_vm1, %v3136_v8  ;;  %v3141_v14 = vsel %vm2399_vm8, 4294967295, %v3140_v14  ;;  %vm857_vm9 = vcmp.ge.s32.totalorder %v163_v13, 32  ;;  %vm858_vm10 = vcmp.lt.s32.totalorder %v163_v13, 40  ;;  %vm553_vm11 = vmand %vm551_vm4, %vm552_vm5  ;;  %vm1010_vm12 = vcmp.ge.s32.totalorder %v163_v13, 40 }
   0x8   :  { %vm1011_vm13 = vcmp.lt.s32.totalorder %v163_v13, 48  ;;  %vm254_vm14 = vcmp.lt.s32.totalorder %v163_v13, 8  ;;  %vm706_vm15 = vmand %vm704_vm6, %vm705_vm7  ;;  %vm1164_vm1 = vcmp.lt.s32.totalorder %v163_v13, 56  ;;  %vm1316_vm3 = vcmp.ge.s32.totalorder %v163_v13, 56 }
   0x9   :  { %vm859_vm2 = vmand %vm857_vm9, %vm858_vm10  ;;  %vm1317_vm8 = vcmp.lt.s32.totalorder %v163_v13, 64  ;;  %v1840_v15 = vsel %vm254_vm14, 1.0, %v3136_v8  ;;  %v1846_v16 = vsel %vm553_vm11, 1.0, %v3136_v8  ;;  %vm3142_vm6 = vnez %v3141_v14 }
   0xa   :  { %vm1012_vm4 = vmand %vm1010_vm12, %vm1011_vm13  ;;  %v1841_v17 = vsel %vm3142_vm6, 1.0, %v3136_v8  ;;  %v1849_v19 = vsel %vm706_vm15, 1.0, %v3136_v8  ;;  %v1852_v20 = vsel %vm859_vm2, 1.0, %v3136_v8  ;;  %v258_v22 = vpack.c.bf16 %v1840_v15, %v1840_v15 }
   0xb   :  { %vm1318_vm7 = vmand %vm1316_vm3, %vm1317_vm8  ;;  %v556_v23 = vpack.c.bf16 %v1846_v16, %v1846_v16  ;;  %v1855_v24 = vsel %vm1012_vm4, 1.0, %v3136_v8  ;;  %v352_v27 = vpack.c.bf16 %v1841_v17, %v1841_v17  ;;  %v709_v31 = vpack.c.bf16 %v1849_v19, %v1849_v19  ;;  %v2539_v16 = vld [vmem:[%s3128_s1] sm:$0xff]  }
   0xc   :  { %1952 = vmatpush3.bf16.xpose.msra.mxu1 %v62_v9  ;;  %v1861_v28 = vsel %vm1318_vm7, 1.0, %v3136_v8  ;;  %v862_v32 = vpack.c.bf16 %v1852_v20, %v1852_v20  ;;  %v1015_v34 = vpack.c.bf16 %v1855_v24, %v1855_v24  ;;  %v485_v58 = vsub.s32 2, %v2465_v56 }
   0xd   :  { %1953 = vmatprep.subr.bf16.mxu1 %v3136_v8  ;;  %v1321_v39 = vpack.c.bf16 %v1861_v28, %v1861_v28  ;;  %v638_v59 = vsub.s32 3, %v2465_v56  ;;  %v944_v60 = vsub.s32 5, %v2465_v56  ;;  %v791_v61 = vsub.s32 4, %v2465_v56 }
   0xe   :  { %v1097_v62 = vsub.s32 6, %v2465_v56  ;;  %v1250_v63 = vsub.s32 7, %v2465_v56  ;;  %v2321_v14 = vmov 71   ;;  %v281_v15 = vsub.s32 1, %v2465_v56 }
   0xf   :  { %vm208_vm9 = vcmask 261120  }
  0x14   :  { %1954 = vmatpush3.bf16.xpose.msra.mxu1 %v65_v10 }
  0x1b   :  { %1956 = vmatmul.mubr.msk.bf16.vlgmr.msra.gmra.mrb[4].mxu1 %vm60_vm0, %v116_v11  ;;  %vm1163_vm0 = vcmp.ge.s32.totalorder %v163_v13, 48  ;;  %v2320_v13 = vmov 70  }
  0x1c   :  { %vm1165_vm5 = vmand %vm1163_vm0, %vm1164_vm1 }
  0x1d   :  { %v1858_v25 = vsel %vm1165_vm5, 1.0, %v3136_v8 }
  0x1e   :  { %v1168_v35 = vpack.c.bf16 %v1858_v25, %v1858_v25 }
  0xd9   :  { %v2408_v18 = vpop.f32.mrb[0].mxu1 }
  0xda   :  { %272 = vperm.xlu1 %2105, %v2408_v18   ;;  %v2413_v21 = vpop.f32.mrb[1].mxu1 }
  0xdb   :  { %264 = vperm.xlu0 %2113, %v2413_v21   ;;  %v2418_v26 = vpop.f32.mrb[2].mxu1 }
  0xdc   :  { %v161_v29 = vpack.c.bf16 %v2418_v26, %v2408_v18  ;;  %v2423_v30 = vpop.f32.mrb[3].mxu1 }
  0xdd   :  { %v160_v33 = vpack.c.bf16 %v2423_v30, %v2413_v21 }
  0xde   :  { %2106 = vset.pattern.permute.xlu1 %v2315_v36  ;;  %v2428_v37 = vmul.bf16 %v258_v22, %v161_v29  ;;  %v2430_v38 = vmul.bf16 %v556_v23, %v161_v29  ;;  %v356_v42 = vmul.bf16 %v352_v27, %v161_v29  ;;  %v2439_v44 = vmul.bf16 %v709_v31, %v161_v29 }
  0xdf   :  { %176 = vperm.xlu1 %2106, %v2408_v18   ;;  %2114 = vset.pattern.permute.xlu0 %v2315_v36  ;;  %v355_v40 = vmul.bf16 %v352_v27, %v160_v33  ;;  %v2434_v41 = vmul.bf16 %v556_v23, %v160_v33  ;;  %v2437_v43 = vmul.bf16 %v709_v31, %v160_v33 }
  0xe0   :  { %166 = vperm.xlu0 %2114, %v2413_v21   ;;  %v2441_v45 = vmul.bf16 %v862_v32, %v160_v33  ;;  %v2443_v46 = vmul.bf16 %v862_v32, %v161_v29  ;;  %v2445_v47 = vmul.bf16 %v1015_v34, %v160_v33  ;;  %v2447_v48 = vmul.bf16 %v1015_v34, %v161_v29 }
  0xe1   :  { %1959 = vmatprep.subr.bf16.mxu0 %v355_v40  ;;  %v2449_v49 = vmul.bf16 %v1168_v35, %v160_v33  ;;  %v2451_v50 = vmul.bf16 %v1168_v35, %v161_v29  ;;  %v2453_v51 = vmul.bf16 %v1321_v39, %v160_v33  ;;  %v2455_v52 = vmul.bf16 %v1321_v39, %v161_v29 }
  0xe2   :  { %1960 = vmatpush3.bf16.msra.mxu0 %v355_v40  ;;  %v2461_v55 = vmul.bf16 %v258_v22, %v160_v33 }
  0xe3   :  { %2107 = vset.pattern.permute.xlu1 %v2316_v53  ;;  %1961 = vmatprep.subr.bf16.mxu0 %v356_v42 }
  0xe4   :  { %476 = vperm.xlu1 %2107, %v2408_v18   ;;  %2116 = vset.pattern.permute.xlu0 %v2317_v54 }
  0xe5   :  { %621 = vperm.xlu0 %2116, %v2413_v21  }
  0xe6   :  { %1962 = vmatpush3.bf16.msra.mxu0 %v356_v42 }
  0xe7   :  { %1967 = vmatprep.subr.bf16.mxu0 %v2461_v55 }
  0xe8   :  { %2108 = vset.pattern.permute.xlu1 %v2317_v54 }
  0xe9   :  { %629 = vperm.xlu1 %2108, %v2408_v18   ;;  %2118 = vset.pattern.permute.xlu0 %v2318_v57 }
  0xea   :  { %927 = vperm.xlu0 %2118, %v2413_v21  }
  0xed   :  { %2109 = vset.pattern.permute.xlu1 %v2319_v0 }
  0xee   :  { %782 = vperm.xlu1 %2109, %v2408_v18   ;;  %2122 = vset.pattern.permute.xlu0 %v2315_v36  ;;  %v2479_v2 = vpop.f32.mrb[4].mxu1 }
  0xef   :  { %181 = vperm.xlu0 %2122, %v2418_v26   ;;  %v1957_v3 = vpop.f32.mrb[5].mxu1  ;;  %v2483_v4 = vrot.slane %v2479_v2, %v485_v58  ;;  %v2486_v5 = vrot.slane %v2479_v2, %v638_v59  ;;  %v2489_v7 = vrot.slane %v2479_v2, %v944_v60  ;;  %v2492_v9 = vrot.slane %v2479_v2, %v791_v61 }
  0xf0   :  { %v157_v6 = vpop.f32.mrb[6].mxu1  ;;  %v2495_v10 = vrot.slane %v2479_v2, %v1097_v62  ;;  %v2498_v11 = vrot.slane %v2479_v2, %v1250_v63  ;;  %v282_v19 = vrot.slane %v2479_v2, %v281_v15 }
  0xf1   :  { %v1958_v12 = vpop.f32.mrb[7].mxu1  ;;  %v3135_v6 = vsub.s32 0, %v2465_v56 }
  0xf2   :  { %2110 = vset.pattern.permute.xlu1 %v2318_v57 }
  0xf3   :  { %935 = vperm.xlu1 %2110, %v2408_v18   ;;  %2124 = vset.pattern.permute.xlu0 %v2317_v54 }
  0xf4   :  { %633 = vperm.xlu0 %2124, %v2418_v26  }
  0xf7   :  { %2111 = vset.pattern.permute.xlu1 %v2320_v13 }
  0xf8   :  { %1088 = vperm.xlu1 %2111, %v2408_v18   ;;  %2126 = vset.pattern.permute.xlu0 %v2318_v57 }
  0xf9   :  { %939 = vperm.xlu0 %2126, %v2418_v26  }
  0xfc   :  { %2112 = vset.pattern.permute.xlu1 %v2321_v14 }
  0xfd   :  { %1241 = vperm.xlu1 %2112, %v2408_v18   ;;  %2127 = vset.pattern.permute.xlu0 %v2320_v13  ;;  %v1883_v18 = vunpack.c.l.bf16 %v2539_v16 }
  0xfe   :  { %1092 = vperm.xlu0 %2127, %v2418_v26  }
  0xff   :  { %v1832_v22 = vadd.f32 -1.0, %v1883_v18 }
 0x101   :  { %2115 = vset.pattern.permute.xlu1 %v2316_v53 }
 0x102   :  { %468 = vperm.xlu1 %2115, %v2413_v21   ;;  %2128 = vset.pattern.permute.xlu0 %v2312_v1 }
 0x103   :  { %268 = vperm.xlu0 %2128, %v2423_v30  }
 0x106   :  { %2117 = vset.pattern.permute.xlu1 %v2319_v0 }
 0x107   :  { %774 = vperm.xlu1 %2117, %v2413_v21   ;;  %2130 = vset.pattern.permute.xlu0 %v2316_v53 }
 0x108   :  { %472 = vperm.xlu0 %2130, %v2423_v30  }
 0x10b   :  { %2119 = vset.pattern.permute.xlu1 %v2320_v13 }
 0x10c   :  { %1080 = vperm.xlu1 %2119, %v2413_v21   ;;  %2132 = vset.pattern.permute.xlu0 %v2319_v0 }
 0x10d   :  { %778 = vperm.xlu0 %2132, %v2423_v30  }
 0x110   :  { %2120 = vset.pattern.permute.xlu1 %v2321_v14 }
 0x111   :  { %1233 = vperm.xlu1 %2120, %v2413_v21   ;;  %2134 = vset.pattern.permute.xlu0 %v2320_v13  ;;  %v2576_v13 = vrot.slane %v2479_v2, %v3135_v6 }
 0x112   :  { %1084 = vperm.xlu0 %2134, %v2423_v30  }
 0x115   :  { %2121 = vset.pattern.permute.xlu1 %v2312_v1  ;;  %v1889_v1 = vld [vmem:[%s3128_s1 + $0x8] sm:$0xff]  }
 0x116   :  { %276 = vperm.xlu1 %2121, %v2418_v26   ;;  %2135 = vset.pattern.permute.xlu0 %v2321_v14  ;;  %v1887_v17 = vunpack.c.l.bf16 %v1889_v1 }
 0x117   :  { %1237 = vperm.xlu0 %2135, %v2423_v30  }
 0x118   :  { %v1834_v20 = vadd.f32 -1.0, %v1887_v17 }
 0x11a   :  { %2123 = vset.pattern.permute.xlu1 %v2316_v53  ;;  %v2543_v27 = vmul.f32 1e+30, %v1834_v20 }
 0x11b   :  { %480 = vperm.xlu1 %2123, %v2418_v26  }
 0x11f   :  { %2125 = vset.pattern.permute.xlu1 %v2319_v0 }
 0x120   :  { %786 = vperm.xlu1 %2125, %v2418_v26  }
 0x124   :  { %2129 = vset.pattern.permute.xlu1 %v2315_v36 }
 0x125   :  { %171 = vperm.xlu1 %2129, %v2423_v30  }
 0x129   :  { %2131 = vset.pattern.permute.xlu1 %v2317_v54 }
 0x12a   :  { %625 = vperm.xlu1 %2131, %v2423_v30  }
 0x12e   :  { %2133 = vset.pattern.permute.xlu1 %v2318_v57 }
 0x12f   :  { %931 = vperm.xlu1 %2133, %v2423_v30   ;;  %v2545_v30 = vmul.f32 1e+30, %v1832_v22 }
 0x133   :  { %2136 = vset.pattern.permute.xlu1 %v2321_v14 }
 0x159   :  { %v273_v21 = vpop.permute.xlu1 %272 }
 0x15a   :  { %v285_v23 = vadd.f32 %v282_v19, %v273_v21  ;;  %v265_v24 = vpop.permute.xlu0 %264 }
 0x15b   :  { %v283_v25 = vadd.f32 %v282_v19, %v265_v24  ;;  %v1884_v24 = vunpack.c.h.bf16 %v2539_v16 }
 0x15c   :  { %v293_v28 = vmul.f32 0.2, %v285_v23  ;;  %vm289_vm1 = vcmp.gt.f32.partialorder %v285_v23, 0.0 }
 0x15d   :  { %v291_v29 = vmul.f32 0.2, %v283_v25  ;;  %vm287_vm8 = vcmp.gt.f32.partialorder %v283_v25, 0.0 }
 0x15e   :  { %v177_v31 = vpop.permute.xlu1 %176  ;;  %v297_v32 = vsel %vm289_vm1, %v285_v23, %v293_v28  ;;  %v1888_v23 = vunpack.c.h.bf16 %v1889_v1 }
 0x15f   :  { %v2548_v33 = vadd.f32 %v297_v32, %v2543_v27  ;;  %v295_v34 = vsel %vm287_vm8, %v283_v25, %v291_v29  ;;  %v167_v40 = vpop.permute.xlu0 %166  ;;  %v190_v17 = vadd.f32 %v2576_v13, %v177_v31 }
 0x160   :  { %v2553_v36 = vadd.f32 %v295_v34, %v2545_v30  ;;  %v188_v15 = vadd.f32 %v2576_v13, %v167_v40  ;;  %v1835_v34 = vadd.f32 -1.0, %v1888_v23 }
 0x161   :  { %v309_v35 = vsel %vm208_vm9, %v2548_v33, -inf  ;;  %v198_v22 = vmul.f32 0.2, %v190_v17  ;;  %vm194_vm11 = vcmp.gt.f32.partialorder %v190_v17, 0.0 }
 0x162   :  { %310 = vmax.xlane.f32.xlu1 %v309_v35  ;;  %v303_v42 = vsel %vm208_vm9, %v2553_v36, -inf  ;;  %v196_v18 = vmul.f32 0.2, %v188_v15  ;;  %vm192_vm10 = vcmp.gt.f32.partialorder %v188_v15, 0.0  ;;  %v1833_v35 = vadd.f32 -1.0, %v1884_v24 }
 0x163   :  { %v2555_v39 = vpop.permute.xlu1 %476  ;;  %v202_v31 = vsel %vm194_vm11, %v190_v17, %v198_v22 }
 0x164   :  { %v2561_v54 = vpop.permute.xlu0 %621  ;;  %v200_v2 = vsel %vm192_vm10, %v188_v15, %v196_v18  ;;  %v2594_v15 = vadd.f32 %v202_v31, %v2543_v27  ;;  %v2599_v18 = vmul.f32 1e+30, %v1835_v34 }
 0x165   :  { %v2589_v32 = vadd.f32 %v200_v2, %v2545_v30 }
 0x166   :  { %304 = vmax.xlane.f32.xlu1 %v303_v42  ;;  %3144 = vst [vmem:[#allocation3_spill] sm:$0xff] %v2599_v18 }
 0x167   :  { %v209_v17 = vsel %vm208_vm9, %v2589_v32, -inf }
 0x168   :  { %v2559_v53 = vpop.permute.xlu1 %629 }
 0x169   :  { %v928_v58 = vpop.permute.xlu0 %927 }
 0x16d   :  { %v783_v57 = vpop.permute.xlu1 %782 }
 0x16e   :  { %v182_v60 = vpop.permute.xlu0 %181  ;;  %v795_v1 = vadd.f32 %v2492_v9, %v783_v57 }
 0x16f   :  { %v191_v40 = vadd.f32 %v2576_v13, %v182_v60  ;;  %v2601_v60 = vmul.f32 1e+30, %v1833_v35 }
 0x170   :  { %v803_v2 = vmul.f32 0.2, %v795_v1  ;;  %vm799_vm0 = vcmp.gt.f32.partialorder %v795_v1, 0.0 }
 0x171   :  { %vm195_vm15 = vcmp.gt.f32.partialorder %v191_v40, 0.0 }
 0x172   :  { %v936_v59 = vpop.permute.xlu1 %935 }
 0x173   :  { %v2568_v63 = vpop.permute.xlu0 %633 }
 0x177   :  { %v2563_v61 = vpop.permute.xlu1 %1088  ;;  %1245 = vperm.xlu1 %2136, %v2418_v26  }
 0x178   :  { %v2570_v3 = vpop.permute.xlu0 %939 }
 0x17c   :  { %v2566_v62 = vpop.permute.xlu1 %1241 }
 0x17d   :  { %v2578_v14 = vpop.permute.xlu0 %1092 }
 0x181   :  { %v469_v0 = vpop.permute.xlu1 %468 }
 0x182   :  { %v269_v20 = vpop.permute.xlu0 %268  ;;  %v487_v57 = vadd.f32 %v2483_v4, %v469_v0 }
 0x183   :  { %v284_v25 = vadd.f32 %v282_v19, %v269_v20 }
 0x184   :  { %vm491_vm3 = vcmp.gt.f32.partialorder %v487_v57, 0.0 }
 0x185   :  { %v292_v42 = vmul.f32 0.2, %v284_v25  ;;  %vm288_vm12 = vcmp.gt.f32.partialorder %v284_v25, 0.0 }
 0x186   :  { %v775_v12 = vpop.permute.xlu1 %774 }
 0x187   :  { %v793_v28 = vadd.f32 %v2492_v9, %v775_v12  ;;  %v946_v12 = vadd.f32 %v2489_v7, %v928_v58  ;;  %v296_v24 = vsel %vm288_vm12, %v284_v25, %v292_v42  ;;  %v215_v58 = vsel %vm208_vm9, %v2594_v15, -inf }
 0x188   :  { %v2612_v0 = vadd.f32 %v296_v24, %v2601_v60  ;;  %v495_v25 = vmul.f32 0.2, %v487_v57 }
 0x189   :  { %v801_v16 = vmul.f32 0.2, %v793_v28  ;;  %vm797_vm14 = vcmp.gt.f32.partialorder %v793_v28, 0.0  ;;  %v954_v34 = vmul.f32 0.2, %v946_v12  ;;  %vm950_vm2 = vcmp.gt.f32.partialorder %v946_v12, 0.0 }
 0x18b   :  { %v2581_v26 = vpop.permute.xlu1 %1080  ;;  %v805_v31 = vsel %vm797_vm14, %v793_v28, %v801_v16 }
 0x18c   :  { %v2616_v42 = vadd.f32 %v805_v31, %v2545_v30 }
 0x190   :  { %v2584_v21 = vpop.permute.xlu1 %1233 }
 0x191   :  { %v1252_v8 = vadd.f32 %v2498_v11, %v2584_v21 }
 0x193   :  { %vm1256_vm11 = vcmp.gt.f32.partialorder %v1252_v8, 0.0 }
 0x195   :  { %v277_v29 = vpop.permute.xlu1 %276 }
 0x196   :  { %v286_v6 = vadd.f32 %v282_v19, %v277_v29  ;;  %v199_v19 = vmul.f32 0.2, %v191_v40 }
 0x198   :  { %v294_v20 = vmul.f32 0.2, %v286_v6  ;;  %vm290_vm13 = vcmp.gt.f32.partialorder %v286_v6, 0.0  ;;  %v203_v28 = vsel %vm195_vm15, %v191_v40, %v199_v19  ;;  %v813_v40 = vsel %vm208_vm9, %v2616_v42, -inf }
 0x199   :  { %v2625_v24 = vadd.f32 %v203_v28, %v2599_v18 }
 0x19a   :  { %v481_v22 = vpop.permute.xlu1 %480  ;;  %v298_v23 = vsel %vm290_vm13, %v286_v6, %v294_v20  ;;  %v948_v6 = vadd.f32 %v2489_v7, %v936_v59  ;;  %v807_v20 = vsel %vm799_vm0, %v795_v1, %v803_v2  ;;  %v958_v59 = vsel %vm950_vm2, %v946_v12, %v954_v34 }
 0x19b   :  { %210 = vmax.xlane.f32.xlu1 %v209_v17  ;;  %v2605_v29 = vadd.f32 %v298_v23, %v2599_v18  ;;  %v489_v17 = vadd.f32 %v2483_v4, %v2555_v39  ;;  %v306_v23 = vsel %vm208_vm9, %v2612_v0, -inf  ;;  %v2630_v19 = vadd.f32 %v807_v20, %v2543_v27  ;;  %v473_v20 = vpop.permute.xlu0 %472 }
 0x19c   :  { %v499_v1 = vsel %vm491_vm3, %v487_v57, %v495_v25  ;;  %v1099_v2 = vadd.f32 %v2495_v10, %v2581_v26  ;;  %vm952_vm4 = vcmp.gt.f32.partialorder %v948_v6, 0.0  ;;  %v218_v12 = vsel %vm208_vm9, %v2625_v24, -inf }
 0x19d   :  { %v312_v35 = vsel %vm208_vm9, %v2605_v29, -inf  ;;  %v497_v39 = vmul.f32 0.2, %v489_v17  ;;  %v2638_v34 = vadd.f32 %v499_v1, %v2545_v30  ;;  %v2641_v28 = vadd.f32 %v958_v59, %v2545_v30 }
 0x19e   :  { %313 = vmax.xlane.f32.xlu0 %v312_v35  ;;  %v956_v35 = vmul.f32 0.2, %v948_v6  ;;  %v490_v57 = vadd.f32 %v2483_v4, %v481_v22  ;;  %v819_v26 = vsel %vm208_vm9, %v2630_v19, -inf  ;;  %vm493_vm5 = vcmp.gt.f32.partialorder %v489_v17, 0.0 }
 0x19f   :  { %v2618_v16 = vpop.permute.xlu1 %786  ;;  %216 = vmax.xlane.f32.xlu1 %v215_v58  ;;  %vm1103_vm7 = vcmp.gt.f32.partialorder %v1099_v2, 0.0  ;;  %v507_v59 = vsel %vm208_vm9, %v2638_v34, -inf  ;;  %v966_v22 = vsel %vm208_vm9, %v2641_v28, -inf }
 0x1a0   :  { %v960_v25 = vsel %vm952_vm4, %v948_v6, %v956_v35  ;;  %v488_v6 = vadd.f32 %v2483_v4, %v473_v20  ;;  %v498_v35 = vmul.f32 0.2, %v490_v57  ;;  %vm494_vm1 = vcmp.gt.f32.partialorder %v490_v57, 0.0 }
 0x1a1   :  { %v640_v4 = vadd.f32 %v2486_v5, %v2561_v54  ;;  %v1254_v20 = vadd.f32 %v2498_v11, %v2566_v62 }
 0x1a2   :  { %307 = vmax.xlane.f32.xlu0 %v306_v23  ;;  %v1107_v23 = vmul.f32 0.2, %v1099_v2  ;;  %vm492_vm10 = vcmp.gt.f32.partialorder %v488_v6, 0.0 }
 0x1a3   :  { %814 = vmax.xlane.f32.xlu1 %v813_v40  ;;  %v648_v54 = vmul.f32 0.2, %v640_v4  ;;  %vm644_vm12 = vcmp.gt.f32.partialorder %v640_v4, 0.0  ;;  %vm1258_vm13 = vcmp.gt.f32.partialorder %v1254_v20, 0.0 }
 0x1a4   :  { %v172_v31 = vpop.permute.xlu1 %171  ;;  %v1111_v56 = vsel %vm1103_vm7, %v1099_v2, %v1107_v23  ;;  %v502_v2 = vsel %vm494_vm1, %v490_v57, %v498_v35  ;;  %v1260_v23 = vmul.f32 0.2, %v1252_v8 }
 0x1a5   :  { %v189_v58 = vadd.f32 %v2576_v13, %v172_v31  ;;  %v1101_v13 = vadd.f32 %v2495_v10, %v2563_v61  ;;  %v501_v31 = vsel %vm493_vm5, %v489_v17, %v497_v39  ;;  %v2671_v21 = vadd.f32 %v1111_v56, %v2545_v30 }
 0x1a6   :  { %219 = vmax.xlane.f32.xlu0 %v218_v12  ;;  %v2657_v12 = vadd.f32 %v960_v25, %v2543_v27  ;;  %v2666_v39 = vadd.f32 %v501_v31, %v2543_v27  ;;  %v1264_v35 = vsel %vm1256_vm11, %v1252_v8, %v1260_v23 }
 0x1a7   :  { %vm193_vm6 = vcmp.gt.f32.partialorder %v189_v58, 0.0  ;;  %v197_v40 = vmul.f32 0.2, %v189_v58  ;;  %820 = vmax.xlane.f32.xlu1 %v819_v26  ;;  %v1109_v26 = vmul.f32 0.2, %v1101_v13  ;;  %vm1105_vm8 = vcmp.gt.f32.partialorder %v1101_v13, 0.0 }
 0x1a8   :  { %v972_v25 = vsel %vm208_vm9, %v2657_v12, -inf  ;;  %v1119_v56 = vsel %vm208_vm9, %v2671_v21, -inf }
 0x1a9   :  { %v201_v1 = vsel %vm193_vm6, %v189_v58, %v197_v40  ;;  %v496_v58 = vmul.f32 0.2, %v488_v6  ;;  %v1113_v40 = vsel %vm1105_vm8, %v1101_v13, %v1109_v26  ;;  %v1262_v13 = vmul.f32 0.2, %v1254_v20  ;;  %v626_v31 = vpop.permute.xlu1 %625 }
 0x1aa   :  { %508 = vmax.xlane.f32.xlu0 %v507_v59  ;;  %v2654_v61 = vadd.f32 %v201_v1, %v2601_v60  ;;  %v642_v59 = vadd.f32 %v2486_v5, %v2559_v53  ;;  %v2680_v1 = vadd.f32 %v502_v2, %v2599_v18  ;;  %v2685_v62 = vadd.f32 %v1113_v40, %v2543_v27 }
 0x1ab   :  { %967 = vmax.xlane.f32.xlu1 %v966_v22  ;;  %v513_v22 = vsel %vm208_vm9, %v2666_v39, -inf  ;;  %v500_v57 = vsel %vm492_vm10, %v488_v6, %v496_v58  ;;  %v641_v2 = vadd.f32 %v2486_v5, %v626_v31  ;;  %v2696_v58 = vadd.f32 %v1264_v35, %v2545_v30  ;;  %v779_v31 = vpop.permute.xlu0 %778 }
 0x1ac   :  { %v212_v17 = vsel %vm208_vm9, %v2654_v61, -inf  ;;  %v650_v53 = vmul.f32 0.2, %v642_v59  ;;  %v516_v26 = vsel %vm208_vm9, %v2680_v1, -inf  ;;  %v1125_v6 = vsel %vm208_vm9, %v2685_v62, -inf }
 0x1ad   :  { %vm646_vm14 = vcmp.gt.f32.partialorder %v642_v59, 0.0  ;;  %v1266_v8 = vsel %vm1258_vm13, %v1254_v20, %v1262_v13  ;;  %vm645_vm15 = vcmp.gt.f32.partialorder %v641_v2, 0.0  ;;  %vm1454_vm10 = vcmask 523264  }
 0x1ae   :  { %213 = vmax.xlane.f32.xlu0 %v212_v17  ;;  %v2690_v17 = vadd.f32 %v500_v57, %v2601_v60  ;;  %v2708_v57 = vadd.f32 %v1266_v8, %v2543_v27 }
 0x1af   :  { %973 = vmax.xlane.f32.xlu1 %v972_v25  ;;  %v652_v25 = vsel %vm644_vm12, %v640_v4, %v648_v54  ;;  %v643_v4 = vadd.f32 %v2486_v5, %v2568_v63  ;;  %v649_v54 = vmul.f32 0.2, %v641_v2  ;;  %v794_v5 = vadd.f32 %v2492_v9, %v779_v31 }
 0x1b0   :  { %v510_v23 = vsel %vm208_vm9, %v2690_v17, -inf  ;;  %v2701_v40 = vadd.f32 %v652_v25, %v2545_v30  ;;  %v1278_v63 = vsel %vm208_vm9, %v2708_v57, -inf }
 0x1b1   :  { %v653_v35 = vsel %vm645_vm15, %v641_v2, %v649_v54  ;;  %vm647_vm0 = vcmp.gt.f32.partialorder %v643_v4, 0.0  ;;  %v802_v25 = vmul.f32 0.2, %v794_v5  ;;  %vm798_vm2 = vcmp.gt.f32.partialorder %v794_v5, 0.0 }
 0x1b2   :  { %514 = vmax.xlane.f32.xlu0 %v513_v22  ;;  %v654_v22 = vsel %vm646_vm14, %v642_v59, %v650_v53  ;;  %v660_v20 = vsel %vm208_vm9, %v2701_v40, -inf  ;;  %v651_v59 = vmul.f32 0.2, %v643_v4  ;;  %vm3146_vm15 = vmmov 0  }
 0x1b3   :  { %1120 = vmax.xlane.f32.xlu1 %v1119_v56  ;;  %v1272_v56 = vsel %vm208_vm9, %v2696_v58, -inf  ;;  %v2713_v13 = vadd.f32 %v654_v22, %v2543_v27  ;;  %v806_v31 = vsel %vm798_vm2, %v794_v5, %v802_v25 }
 0x1b4   :  { %v655_v8 = vsel %vm647_vm0, %v643_v4, %v651_v59 }
 0x1b5   :  { %v666_v53 = vsel %vm208_vm9, %v2713_v13, -inf  ;;  %v2728_v2 = vadd.f32 %v655_v8, %v2599_v18 }
 0x1b6   :  { %517 = vmax.xlane.f32.xlu0 %v516_v26  ;;  %v2721_v26 = vadd.f32 %v653_v35, %v2601_v60 }
 0x1b7   :  { %1126 = vmax.xlane.f32.xlu1 %v1125_v6  ;;  %v796_v6 = vadd.f32 %v2492_v9, %v2618_v16  ;;  %v2734_v9 = vadd.f32 %v806_v31, %v2601_v60  ;;  %v949_v16 = vadd.f32 %v2489_v7, %v2570_v3 }
 0x1b8   :  { %v663_v22 = vsel %vm208_vm9, %v2721_v26, -inf }
 0x1b9   :  { %v804_v54 = vmul.f32 0.2, %v796_v6  ;;  %vm800_vm3 = vcmp.gt.f32.partialorder %v796_v6, 0.0  ;;  %v816_v35 = vsel %vm208_vm9, %v2734_v9, -inf  ;;  %vm953_vm5 = vcmp.gt.f32.partialorder %v949_v16, 0.0 }
 0x1ba   :  { %511 = vmax.xlane.f32.xlu0 %v510_v23  ;;  %v932_v23 = vpop.permute.xlu1 %931 }
 0x1bb   :  { %1273 = vmax.xlane.f32.xlu1 %v1272_v56  ;;  %v947_v56 = vadd.f32 %v2489_v7, %v932_v23  ;;  %v808_v59 = vsel %vm800_vm3, %v796_v6, %v804_v54  ;;  %v1102_v6 = vadd.f32 %v2495_v10, %v2578_v14 }
 0x1bc   :  { %v2741_v5 = vadd.f32 %v808_v59, %v2599_v18 }
 0x1bd   :  { %v955_v4 = vmul.f32 0.2, %v947_v56  ;;  %vm951_vm4 = vcmp.gt.f32.partialorder %v947_v56, 0.0  ;;  %vm1106_vm7 = vcmp.gt.f32.partialorder %v1102_v6, 0.0 }
 0x1be   :  { %661 = vmax.xlane.f32.xlu0 %v660_v20  ;;  %v669_v20 = vsel %vm208_vm9, %v2728_v2, -inf  ;;  %v822_v7 = vsel %vm208_vm9, %v2741_v5, -inf }
 0x1bf   :  { %1279 = vmax.xlane.f32.xlu1 %v1278_v63  ;;  %v1085_v63 = vpop.permute.xlu0 %1084  ;;  %v959_v8 = vsel %vm951_vm4, %v947_v56, %v955_v4  ;;  %v1110_v56 = vmul.f32 0.2, %v1102_v6 }
 0x1c0   :  { %v1100_v25 = vadd.f32 %v2495_v10, %v1085_v63  ;;  %v2747_v3 = vadd.f32 %v959_v8, %v2601_v60 }
 0x1c1   :  { %v1114_v10 = vsel %vm1106_vm7, %v1102_v6, %v1110_v56 }
 0x1c2   :  { %667 = vmax.xlane.f32.xlu0 %v666_v53  ;;  %v957_v53 = vmul.f32 0.2, %v949_v16  ;;  %v1108_v23 = vmul.f32 0.2, %v1100_v25  ;;  %vm1104_vm6 = vcmp.gt.f32.partialorder %v1100_v25, 0.0  ;;  %v969_v54 = vsel %vm208_vm9, %v2747_v3, -inf }
 0x1c6   :  { %664 = vmax.xlane.f32.xlu0 %v663_v22  ;;  %v961_v22 = vsel %vm953_vm5, %v949_v16, %v957_v53  ;;  %v2764_v16 = vadd.f32 %v1114_v10, %v2599_v18  ;;  %v1238_v53 = vpop.permute.xlu0 %1237  ;;  %vm1746_vm5 = vcmask 31744  }
 0x1c7   :  { %v2754_v31 = vadd.f32 %v961_v22, %v2599_v18 }
 0x1c8   :  { %v1128_v63 = vsel %vm208_vm9, %v2764_v16, -inf }
 0x1c9   :  { %v975_v4 = vsel %vm208_vm9, %v2754_v31, -inf }
 0x1ca   :  { %670 = vmax.xlane.f32.xlu0 %v669_v20  ;;  %v1112_v20 = vsel %vm1104_vm6, %v1100_v25, %v1108_v23 }
 0x1cb   :  { %v2759_v59 = vadd.f32 %v1112_v20, %v2601_v60 }
 0x1cd   :  { %v1122_v14 = vsel %vm208_vm9, %v2759_v59, -inf }
 0x1ce   :  { %817 = vmax.xlane.f32.xlu0 %v816_v35 }
 0x1d2   :  { %823 = vmax.xlane.f32.xlu0 %v822_v7  ;;  %v1253_v7 = vadd.f32 %v2498_v11, %v1238_v53 }
 0x1d4   :  { %v1261_v56 = vmul.f32 0.2, %v1253_v7  ;;  %vm1257_vm1 = vcmp.gt.f32.partialorder %v1253_v7, 0.0 }
 0x1d6   :  { %970 = vmax.xlane.f32.xlu0 %v969_v54 }
 0x1da   :  { %976 = vmax.xlane.f32.xlu0 %v975_v4 }
 0x1de   :  { %1123 = vmax.xlane.f32.xlu0 %v1122_v14  ;;  %v1265_v14 = vsel %vm1257_vm1, %v1253_v7, %v1261_v56 }
 0x1e2   :  { %1129 = vmax.xlane.f32.xlu0 %v1128_v63 }
 0x1ef   :  { %v311_v35 = vpop.xlane.xlu1 %310 }
 0x1f0   :  { %v317_v25 = vsub.f32 %v2548_v33, %v311_v35 }
 0x1f2   :  { %v323_v23 = vmul.f32 1.442695, %v317_v25 }
 0x1f3   :  { %v305_v8 = vpop.xlane.xlu1 %304 }
 0x1f4   :  { %v315_v6 = vsub.f32 %v2553_v36, %v305_v8  ;;  %v2778_v36 = vadd.f32 %v1265_v14, %v2601_v60 }
 0x1f6   :  { %v319_v22 = vmul.f32 1.442695, %v315_v6 }
 0x1f7   :  { %v1246_v54 = vpop.permute.xlu1 %1245 }
 0x1f8   :  { %2144 = vpow2.f32 %v319_v22  ;;  %v1255_v20 = vadd.f32 %v2498_v11, %v1246_v54  ;;  %v1275_v11 = vsel %vm208_vm9, %v2778_v36, -inf }
 0x1f9   :  { %2146 = vpow2.f32 %v323_v23 }
 0x1fa   :  { %vm1259_vm8 = vcmp.gt.f32.partialorder %v1255_v20, 0.0  ;;  %v1263_v4 = vmul.f32 0.2, %v1255_v20 }
 0x1fc   :  { %v1267_v10 = vsel %vm1259_vm8, %v1255_v20, %v1263_v4 }
 0x1fd   :  { %v2773_v33 = vadd.f32 %v1267_v10, %v2599_v18 }
 0x1ff   :  { %v1281_v63 = vsel %vm208_vm9, %v2773_v33, -inf }
 0x200   :  { %1282 = vmax.xlane.f32.xlu0 %v1281_v63 }
 0x202   :  { %v2780_v35 = vpop.eup %2144 }
 0x203   :  { %v327_v53 = vsel %vm208_vm9, %v2780_v35, 0.0  ;;  %v2786_v25 = vpop.eup %2146 }
 0x204   :  { %1276 = vmax.xlane.f32.xlu0 %v1275_v11  ;;  %328 = vadd.xlane.f32.xlu1 %v327_v53  ;;  %v333_v8 = vsel %vm208_vm9, %v2786_v25, 0.0 }
 0x208   :  { %334 = vadd.xlane.f32.xlu1 %v333_v8 }
 0x228   :  { %v211_v7 = vpop.xlane.xlu1 %210 }
 0x229   :  { %v221_v6 = vsub.f32 %v2589_v32, %v211_v7 }
 0x22b   :  { %v225_v23 = vmul.f32 1.442695, %v221_v6  ;;  %v314_v22 = vpop.xlane.xlu0 %313 }
 0x22c   :  { %v217_v54 = vpop.xlane.xlu1 %216  ;;  %v318_v20 = vsub.f32 %v2605_v29, %v314_v22 }
 0x22d   :  { %2148 = vpow2.f32 %v225_v23  ;;  %v223_v56 = vsub.f32 %v2594_v15, %v217_v54 }
 0x22e   :  { %v325_v63 = vmul.f32 1.442695, %v318_v20 }
 0x22f   :  { %v229_v4 = vmul.f32 1.442695, %v223_v56  ;;  %v308_v10 = vpop.xlane.xlu0 %307 }
 0x230   :  { %v316_v14 = vsub.f32 %v2612_v0, %v308_v10  ;;  %v815_v56 = vpop.xlane.xlu1 %814 }
 0x231   :  { %2150 = vpow2.f32 %v229_v4 }
 0x232   :  { %v321_v11 = vmul.f32 1.442695, %v316_v14 }
 0x233   :  { %v220_v53 = vpop.xlane.xlu0 %219 }
 0x234   :  { %2152 = vpow2.f32 %v321_v11  ;;  %v224_v29 = vsub.f32 %v2625_v24, %v220_v53  ;;  %v821_v11 = vpop.xlane.xlu1 %820 }
 0x235   :  { %2154 = vpow2.f32 %v325_v63 }
 0x237   :  { %v2794_v8 = vpop.eup %2148  ;;  %v509_v32 = vpop.xlane.xlu0 %508 }
 0x238   :  { %v519_v7 = vsub.f32 %v2638_v34, %v509_v32  ;;  %v233_v15 = vsel %vm208_vm9, %v2794_v8, 0.0  ;;  %v231_v34 = vmul.f32 1.442695, %v224_v29 }
 0x239   :  { %234 = vadd.xlane.f32.xlu1 %v233_v15 }
 0x23a   :  { %v523_v6 = vmul.f32 1.442695, %v519_v7 }
 0x23b   :  { %v2800_v23 = vpop.eup %2150  ;;  %v214_v0 = vpop.xlane.xlu0 %213 }
 0x23c   :  { %2156 = vpow2.f32 %v523_v6  ;;  %v222_v22 = vsub.f32 %v2654_v61, %v214_v0  ;;  %v239_v54 = vsel %vm208_vm9, %v2800_v23, 0.0  ;;  %v968_v0 = vpop.xlane.xlu1 %967 }
 0x23d   :  { %240 = vadd.xlane.f32.xlu1 %v239_v54 }
 0x23e   :  { %v2805_v20 = vpop.eup %2152  ;;  %v227_v4 = vmul.f32 1.442695, %v222_v22 }
 0x23f   :  { %v515_v10 = vpop.xlane.xlu0 %514  ;;  %v330_v24 = vsel %vm208_vm9, %v2805_v20, 0.0  ;;  %v2809_v14 = vpop.eup %2154 }
 0x240   :  { %2158 = vpow2.f32 %v227_v4  ;;  %v521_v63 = vsub.f32 %v2666_v39, %v515_v10  ;;  %331 = vadd.xlane.f32.xlu0 %v330_v24  ;;  %v336_v32 = vsel %vm208_vm9, %v2809_v14, 0.0 }
 0x241   :  { %2160 = vpow2.f32 %v231_v34 }
 0x242   :  { %v527_v61 = vmul.f32 1.442695, %v521_v63 }
 0x243   :  { %v518_v53 = vpop.xlane.xlu0 %517 }
 0x244   :  { %2162 = vpow2.f32 %v527_v61  ;;  %337 = vadd.xlane.f32.xlu0 %v336_v32  ;;  %v522_v15 = vsub.f32 %v2680_v1, %v518_v53  ;;  %v974_v53 = vpop.xlane.xlu1 %973 }
 0x246   :  { %v2814_v7 = vpop.eup %2156  ;;  %v529_v54 = vmul.f32 1.442695, %v522_v15 }
 0x247   :  { %v512_v29 = vpop.xlane.xlu0 %511  ;;  %v531_v6 = vsel %vm208_vm9, %v2814_v7, 0.0 }
 0x248   :  { %v520_v39 = vsub.f32 %v2690_v17, %v512_v29  ;;  %532 = vadd.xlane.f32.xlu1 %v531_v6  ;;  %v825_v17 = vsub.f32 %v2616_v42, %v815_v56 }
 0x24a   :  { %v2820_v22 = vpop.eup %2158  ;;  %v525_v34 = vmul.f32 1.442695, %v520_v39  ;;  %v827_v39 = vsub.f32 %v2630_v19, %v821_v11 }
 0x24b   :  { %v662_v4 = vpop.xlane.xlu0 %661  ;;  %v236_v10 = vsel %vm208_vm9, %v2820_v22, 0.0  ;;  %v2824_v24 = vpop.eup %2160 }
 0x24c   :  { %2164 = vpow2.f32 %v525_v34  ;;  %v672_v1 = vsub.f32 %v2701_v40, %v662_v4  ;;  %237 = vadd.xlane.f32.xlu0 %v236_v10  ;;  %v242_v15 = vsel %vm208_vm9, %v2824_v24, 0.0  ;;  %v829_v40 = vmul.f32 1.442695, %v825_v17 }
 0x24d   :  { %2166 = vpow2.f32 %v529_v54  ;;  %v1121_v54 = vpop.xlane.xlu1 %1120  ;;  %v833_v10 = vmul.f32 1.442695, %v827_v39 }
 0x24e   :  { %v2827_v63 = vpop.eup %2162  ;;  %v676_v61 = vmul.f32 1.442695, %v672_v1  ;;  %v978_v1 = vsub.f32 %v2641_v28, %v968_v0 }
 0x24f   :  { %v668_v32 = vpop.xlane.xlu0 %667  ;;  %v537_v29 = vsel %vm208_vm9, %v2827_v63, 0.0 }
 0x250   :  { %2168 = vpow2.f32 %v676_v61  ;;  %v674_v6 = vsub.f32 %v2713_v13, %v668_v32  ;;  %243 = vadd.xlane.f32.xlu0 %v242_v15  ;;  %538 = vadd.xlane.f32.xlu1 %v537_v29  ;;  %v980_v32 = vsub.f32 %v2657_v12, %v974_v53  ;;  %v1131_v12 = vsub.f32 %v2671_v21, %v1121_v54 }
 0x251   :  { %v1127_v29 = vpop.xlane.xlu1 %1126 }
 0x252   :  { %v680_v34 = vmul.f32 1.442695, %v674_v6 }
 0x253   :  { %v665_v42 = vpop.xlane.xlu0 %664 }
 0x254   :  { %2170 = vpow2.f32 %v680_v34  ;;  %v673_v56 = vsub.f32 %v2721_v26, %v665_v42  ;;  %v982_v26 = vmul.f32 1.442695, %v978_v1  ;;  %v1135_v1 = vmul.f32 1.442695, %v1131_v12 }
 0x255   :  { %2172 = vpow2.f32 %v829_v40 }
 0x256   :  { %v2837_v4 = vpop.eup %2164  ;;  %v678_v61 = vmul.f32 1.442695, %v673_v56 }
 0x257   :  { %v671_v18 = vpop.xlane.xlu0 %670  ;;  %v534_v13 = vsel %vm208_vm9, %v2837_v4, 0.0  ;;  %v2842_v17 = vpop.eup %2166 }
 0x258   :  { %2174 = vpow2.f32 %v678_v61  ;;  %v675_v19 = vsub.f32 %v2728_v2, %v671_v18  ;;  %535 = vadd.xlane.f32.xlu0 %v534_v13  ;;  %v540_v0 = vsel %vm208_vm9, %v2842_v17, 0.0  ;;  %v986_v2 = vmul.f32 1.442695, %v980_v32 }
 0x259   :  { %2176 = vpow2.f32 %v833_v10  ;;  %v1133_v61 = vsub.f32 %v2685_v62, %v1127_v29 }
 0x25a   :  { %v2845_v11 = vpop.eup %2168  ;;  %v682_v15 = vmul.f32 1.442695, %v675_v19 }
 0x25b   :  { %v818_v28 = vpop.xlane.xlu0 %817  ;;  %v684_v6 = vsel %vm208_vm9, %v2845_v11, 0.0 }
 0x25c   :  { %2178 = vpow2.f32 %v682_v15  ;;  %v826_v40 = vsub.f32 %v2734_v9, %v818_v28  ;;  %541 = vadd.xlane.f32.xlu0 %v540_v0  ;;  %685 = vadd.xlane.f32.xlu1 %v684_v6  ;;  %v1274_v9 = vpop.xlane.xlu1 %1273  ;;  %v1139_v15 = vmul.f32 1.442695, %v1133_v61 }
 0x25d   :  { %2180 = vpow2.f32 %v982_v26  ;;  %v1284_v62 = vsub.f32 %v2696_v58, %v1274_v9 }
 0x25e   :  { %v2853_v18 = vpop.eup %2170  ;;  %v831_v53 = vmul.f32 1.442695, %v826_v40 }
 0x25f   :  { %v824_v39 = vpop.xlane.xlu0 %823  ;;  %v690_v34 = vsel %vm208_vm9, %v2853_v18, 0.0  ;;  %v2858_v42 = vpop.eup %2172  ;;  %v1288_v58 = vmul.f32 1.442695, %v1284_v62 }
 0x260   :  { %2182 = vpow2.f32 %v831_v53  ;;  %v828_v56 = vsub.f32 %v2741_v5, %v824_v39  ;;  %691 = vadd.xlane.f32.xlu1 %v690_v34  ;;  %v837_v19 = vsel %vm208_vm9, %v2858_v42, 0.0  ;;  %v1280_v28 = vpop.xlane.xlu1 %1279 }
 0x261   :  { %2184 = vpow2.f32 %v986_v2  ;;  %v1286_v53 = vsub.f32 %v2708_v57, %v1280_v28 }
 0x262   :  { %v2861_v10 = vpop.eup %2174  ;;  %v835_v13 = vmul.f32 1.442695, %v828_v56 }
 0x263   :  { %v971_v21 = vpop.xlane.xlu0 %970  ;;  %v687_v54 = vsel %vm208_vm9, %v2861_v10, 0.0  ;;  %v2868_v26 = vpop.eup %2176 }
 0x264   :  { %2186 = vpow2.f32 %v835_v13  ;;  %v979_v5 = vsub.f32 %v2747_v3, %v971_v21  ;;  %688 = vadd.xlane.f32.xlu0 %v687_v54  ;;  %838 = vadd.xlane.f32.xlu1 %v837_v19  ;;  %v843_v40 = vsel %vm208_vm9, %v2868_v26, 0.0  ;;  %v1292_v13 = vmul.f32 1.442695, %v1286_v53 }
 0x265   :  { %2188 = vpow2.f32 %v1135_v1 }
 0x266   :  { %v2871_v32 = vpop.eup %2178  ;;  %v984_v29 = vmul.f32 1.442695, %v979_v5 }
 0x267   :  { %v977_v0 = vpop.xlane.xlu0 %976  ;;  %v693_v6 = vsel %vm208_vm9, %v2871_v32, 0.0  ;;  %v2878_v2 = vpop.eup %2180 }
 0x268   :  { %2190 = vpow2.f32 %v984_v29  ;;  %v981_v3 = vsub.f32 %v2754_v31, %v977_v0  ;;  %694 = vadd.xlane.f32.xlu0 %v693_v6  ;;  %844 = vadd.xlane.f32.xlu1 %v843_v40  ;;  %v990_v9 = vsel %vm208_vm9, %v2878_v2, 0.0 }
 0x269   :  { %2192 = vpow2.f32 %v1139_v15 }
 0x26a   :  { %v2881_v12 = vpop.eup %2182  ;;  %v988_v39 = vmul.f32 1.442695, %v981_v3 }
 0x26b   :  { %v1124_v34 = vpop.xlane.xlu0 %1123  ;;  %v840_v56 = vsel %vm208_vm9, %v2881_v12, 0.0  ;;  %v2888_v1 = vpop.eup %2184 }
 0x26c   :  { %2194 = vpow2.f32 %v988_v39  ;;  %v1132_v31 = vsub.f32 %v2759_v59, %v1124_v34  ;;  %841 = vadd.xlane.f32.xlu0 %v840_v56  ;;  %991 = vadd.xlane.f32.xlu1 %v990_v9  ;;  %v996_v19 = vsel %vm208_vm9, %v2888_v1, 0.0 }
 0x26d   :  { %2196 = vpow2.f32 %v1288_v58 }
 0x26e   :  { %v2891_v61 = vpop.eup %2186  ;;  %v1137_v57 = vmul.f32 1.442695, %v1132_v31 }
 0x26f   :  { %v1130_v21 = vpop.xlane.xlu0 %1129  ;;  %v846_v54 = vsel %vm208_vm9, %v2891_v61, 0.0  ;;  %v2897_v5 = vpop.eup %2188 }
 0x270   :  { %2198 = vpow2.f32 %v1137_v57  ;;  %v1134_v15 = vsub.f32 %v2764_v16, %v1130_v21  ;;  %847 = vadd.xlane.f32.xlu0 %v846_v54  ;;  %997 = vadd.xlane.f32.xlu1 %v996_v19  ;;  %v1143_v28 = vsel %vm208_vm9, %v2897_v5, 0.0 }
 0x271   :  { %2200 = vpow2.f32 %v1292_v13 }
 0x272   :  { %v2900_v59 = vpop.eup %2190  ;;  %v1141_v62 = vmul.f32 1.442695, %v1134_v15 }
 0x273   :  { %v993_v29 = vsel %vm208_vm9, %v2900_v59, 0.0  ;;  %v2906_v0 = vpop.eup %2192 }
 0x274   :  { %2202 = vpow2.f32 %v1141_v62  ;;  %994 = vadd.xlane.f32.xlu0 %v993_v29  ;;  %1144 = vadd.xlane.f32.xlu1 %v1143_v28  ;;  %v1149_v40 = vsel %vm208_vm9, %v2906_v0, 0.0 }
 0x276   :  { %v2908_v6 = vpop.eup %2194 }
 0x277   :  { %v999_v16 = vsel %vm208_vm9, %v2908_v6, 0.0  ;;  %v2914_v3 = vpop.eup %2196 }
 0x278   :  { %1000 = vadd.xlane.f32.xlu0 %v999_v16  ;;  %1150 = vadd.xlane.f32.xlu1 %v1149_v40  ;;  %v1296_v39 = vsel %vm208_vm9, %v2914_v3, 0.0 }
 0x27a   :  { %v2916_v58 = vpop.eup %2198 }
 0x27b   :  { %v1146_v53 = vsel %vm208_vm9, %v2916_v58, 0.0  ;;  %v2922_v34 = vpop.eup %2200 }
 0x27c   :  { %1147 = vadd.xlane.f32.xlu0 %v1146_v53  ;;  %1297 = vadd.xlane.f32.xlu1 %v1296_v39  ;;  %v1302_v31 = vsel %vm208_vm9, %v2922_v34, 0.0 }
 0x27e   :  { %v2924_v56 = vpop.eup %2202 }
 0x27f   :  { %v1152_v9 = vsel %vm208_vm9, %v2924_v56, 0.0 }
 0x280   :  { %1153 = vadd.xlane.f32.xlu0 %v1152_v9  ;;  %1303 = vadd.xlane.f32.xlu1 %v1302_v31 }
 0x28d   :  { %v1283_v13 = vpop.xlane.xlu0 %1282 }
 0x28e   :  { %v1287_v57 = vsub.f32 %v2773_v33, %v1283_v13 }
 0x290   :  { %v1294_v19 = vmul.f32 1.442695, %v1287_v57 }
 0x291   :  { %v1277_v21 = vpop.xlane.xlu0 %1276  ;;  %v329_v33 = vpop.xlane.xlu1 %328 }
 0x292   :  { %v1285_v54 = vsub.f32 %v2778_v36, %v1277_v21 }
 0x294   :  { %v1290_v15 = vmul.f32 1.442695, %v1285_v54 }
 0x295   :  { %v335_v40 = vpop.xlane.xlu1 %334 }
 0x296   :  { %2204 = vpow2.f32 %v1290_v15 }
 0x297   :  { %2206 = vpow2.f32 %v1294_v19 }
 0x298   :  { %2208 = vrcp.f32 %v329_v33 }
 0x2a0   :  { %v2932_v62 = vpop.eup %2204 }
 0x2a1   :  { %v1299_v29 = vsel %vm208_vm9, %v2932_v62, 0.0  ;;  %v2936_v28 = vpop.eup %2206 }
 0x2a2   :  { %1300 = vadd.xlane.f32.xlu0 %v1299_v29  ;;  %v1305_v16 = vsel %vm208_vm9, %v2936_v28, 0.0  ;;  %v2209_v9 = vpop.eup %2208 }
 0x2a3   :  { %v343_v21 = vmul.f32 %v2209_v9, %v2780_v35 }
 0x2a6   :  { %1306 = vadd.xlane.f32.xlu0 %v1305_v16 }
 0x2c6   :  { %v235_v39 = vpop.xlane.xlu1 %234 }
 0x2ca   :  { %v241_v13 = vpop.xlane.xlu1 %240 }
 0x2cd   :  { %v332_v36 = vpop.xlane.xlu0 %331 }
 0x2ce   :  { %2210 = vrcp.f32 %v332_v36 }
 0x2cf   :  { %2212 = vrcp.f32 %v335_v40 }
 0x2d1   :  { %v338_v53 = vpop.xlane.xlu0 %337 }
 0x2d2   :  { %2214 = vrcp.f32 %v338_v53 }
 0x2d3   :  { %2216 = vrcp.f32 %v235_v39 }
 0x2d5   :  { %v533_v53 = vpop.xlane.xlu1 %532 }
 0x2d8   :  { %v2211_v31 = vpop.eup %2210 }
 0x2d9   :  { %v238_v57 = vpop.xlane.xlu0 %237  ;;  %v344_v54 = vmul.f32 %v2211_v31, %v2805_v20  ;;  %v2213_v19 = vpop.eup %2212 }
 0x2da   :  { %2218 = vrcp.f32 %v238_v57  ;;  %v345_v33 = vmul.f32 %v2213_v19, %v2786_v25 }
 0x2db   :  { %v353_v15 = vpack.c.bf16 %v344_v54, %v343_v21  ;;  %2220 = vrcp.f32 %v241_v13 }
 0x2dc   :  { %v2215_v29 = vpop.eup %2214 }
 0x2dd   :  { %v244_v16 = vpop.xlane.xlu0 %243  ;;  %1963 = vmatprep.mubr.msk.bf16.mxu0 %vm208_vm9, %v353_v15  ;;  %v346_v40 = vmul.f32 %v2215_v29, %v2809_v14  ;;  %v2217_v35 = vpop.eup %2216 }
 0x2de   :  { %2222 = vrcp.f32 %v244_v16  ;;  %v539_v39 = vpop.xlane.xlu1 %538  ;;  %v249_v31 = vmul.f32 %v2217_v35, %v2794_v8 }
 0x2df   :  { %v354_v36 = vpack.c.bf16 %v346_v40, %v345_v33  ;;  %2224 = vrcp.f32 %v533_v53 }
 0x2e1   :  { %1964 = vmatmul.mubr.msk.bf16.vlgmr.msra.gmra.mrb[0].mxu0 %vm208_vm9, %v354_v36 }
 0x2e2   :  { %1968 = vmatpush3.bf16.msra.mxu0 %v2461_v55 }
 0x2e3   :  { %1969 = vmatprep.subr.bf16.mxu0 %v2428_v37 }
 0x2e4   :  { %v2219_v20 = vpop.eup %2218 }
 0x2e5   :  { %v536_v9 = vpop.xlane.xlu0 %535  ;;  %v250_v25 = vmul.f32 %v2219_v20, %v2820_v22  ;;  %v2221_v13 = vpop.eup %2220 }
 0x2e6   :  { %2226 = vrcp.f32 %v536_v9  ;;  %1970 = vmatpush3.bf16.msra.mxu0 %v2428_v37  ;;  %v251_v55 = vmul.f32 %v2221_v13, %v2800_v23 }
 0x2e7   :  { %1975 = vmatprep.subr.bf16.mxu0 %v2434_v41  ;;  %v259_v14 = vpack.c.bf16 %v250_v25, %v249_v31  ;;  %2228 = vrcp.f32 %v539_v39 }
 0x2e8   :  { %v2223_v57 = vpop.eup %2222 }
 0x2e9   :  { %v252_v21 = vmul.f32 %v2223_v57, %v2824_v24  ;;  %v542_v54 = vpop.xlane.xlu0 %541  ;;  %1971 = vmatprep.mubr.msk.bf16.mxu0 %vm208_vm9, %v259_v14  ;;  %v686_v19 = vpop.xlane.xlu1 %685 }
 0x2ea   :  { %2230 = vrcp.f32 %v542_v54  ;;  %v2225_v15 = vpop.eup %2224 }
 0x2eb   :  { %v260_v8 = vpack.c.bf16 %v252_v21, %v251_v55  ;;  %2232 = vrcp.f32 %v686_v19  ;;  %v547_v24 = vmul.f32 %v2225_v15, %v2814_v7 }
 0x2ed   :  { %1972 = vmatmul.mubr.msk.bf16.vlgmr.msra.gmra.mrb[0].mxu0 %vm208_vm9, %v260_v8  ;;  %v692_v22 = vpop.xlane.xlu1 %691 }
 0x2ee   :  { %1976 = vmatpush3.bf16.msra.mxu0 %v2434_v41 }
 0x2ef   :  { %1977 = vmatprep.subr.bf16.mxu0 %v2430_v38 }
 0x2f0   :  { %v2227_v37 = vpop.eup %2226 }
 0x2f1   :  { %v689_v29 = vpop.xlane.xlu0 %688  ;;  %v839_v23 = vpop.xlane.xlu1 %838  ;;  %v548_v16 = vmul.f32 %v2227_v37, %v2837_v4 }
 0x2f2   :  { %v2229_v33 = vpop.eup %2228  ;;  %2234 = vrcp.f32 %v689_v29  ;;  %1978 = vmatpush3.bf16.msra.mxu0 %v2430_v38 }
 0x2f3   :  { %1983 = vmatprep.subr.bf16.mxu0 %v2437_v43  ;;  %v557_v40 = vpack.c.bf16 %v548_v16, %v547_v24  ;;  %2236 = vrcp.f32 %v692_v22  ;;  %v549_v41 = vmul.f32 %v2229_v33, %v2827_v63 }
 0x2f4   :  { %v2231_v36 = vpop.eup %2230 }
 0x2f5   :  { %v550_v53 = vmul.f32 %v2231_v36, %v2842_v17  ;;  %v695_v35 = vpop.xlane.xlu0 %694  ;;  %1979 = vmatprep.mubr.msk.bf16.mxu0 %vm208_vm9, %v557_v40  ;;  %v845_v7 = vpop.xlane.xlu1 %844 }
 0x2f6   :  { %2238 = vrcp.f32 %v695_v35  ;;  %v2233_v38 = vpop.eup %2232 }
 0x2f7   :  { %v558_v20 = vpack.c.bf16 %v550_v53, %v549_v41  ;;  %2240 = vrcp.f32 %v839_v23  ;;  %v700_v17 = vmul.f32 %v2233_v38, %v2845_v11 }
 0x2f9   :  { %v842_v4 = vpop.xlane.xlu0 %841  ;;  %1980 = vmatmul.mubr.msk.bf16.vlgmr.msra.gmra.mrb[0].mxu0 %vm208_vm9, %v558_v20  ;;  %v992_v63 = vpop.xlane.xlu1 %991 }
 0x2fa   :  { %2242 = vrcp.f32 %v842_v4  ;;  %1984 = vmatpush3.bf16.msra.mxu0 %v2437_v43 }
 0x2fb   :  { %1985 = vmatprep.subr.bf16.mxu0 %v2439_v44 }
 0x2fc   :  { %v2235_v39 = vpop.eup %2234 }
 0x2fd   :  { %v848_v9 = vpop.xlane.xlu0 %847  ;;  %v701_v31 = vmul.f32 %v2235_v39, %v2861_v10  ;;  %v2237_v25 = vpop.eup %2236 }
 0x2fe   :  { %2244 = vrcp.f32 %v848_v9  ;;  %1986 = vmatpush3.bf16.msra.mxu0 %v2439_v44  ;;  %v702_v43 = vmul.f32 %v2237_v25, %v2853_v18  ;;  %v998_v54 = vpop.xlane.xlu1 %997  ;;  %v3145_v25 = vmov 0.0  }
 0x2ff   :  { %2246 = vrcp.f32 %v845_v7  ;;  %1991 = vmatprep.subr.bf16.mxu0 %v2441_v45  ;;  %v710_v13 = vpack.c.bf16 %v701_v31, %v700_v17  ;;  %1800 = vst [vmem:[%s3129_s8 + $0x8] sm:$0xff] %v3145_v25  ;;  %1799 = vst [vmem:[%s3129_s8] sm:$0xff] %v3145_v25 }
 0x300   :  { %v2239_v14 = vpop.eup %2238  ;;  %2248 = vrcp.f32 %v992_v63  ;;  %1801 = vst [vmem:[%s3129_s8 + $0x10] sm:$0xff] %v3145_v25  ;;  %1802 = vst [vmem:[%s3129_s8 + $0x18] sm:$0xff] %v3145_v25 }
 0x301   :  { %v703_v57 = vmul.f32 %v2239_v14, %v2871_v32  ;;  %v995_v55 = vpop.xlane.xlu0 %994  ;;  %1987 = vmatprep.mubr.msk.bf16.mxu0 %vm208_vm9, %v710_v13  ;;  %v2241_v11 = vpop.eup %2240  ;;  %v1864_v13 = vld [vmem:[%s3131_s4] ss:$0 sm:$0xff] }
 0x302   :  { %2250 = vrcp.f32 %v995_v55  ;;  %v853_v44 = vmul.f32 %v2241_v11, %v2858_v42  ;;  %v1145_v29 = vpop.xlane.xlu1 %1144 }
 0x303   :  { %v711_v10 = vpack.c.bf16 %v703_v57, %v702_v43 }
 0x304   :  { %v2243_v21 = vpop.eup %2242 }
 0x305   :  { %v1001_v19 = vpop.xlane.xlu0 %1000  ;;  %1988 = vmatmul.mubr.msk.bf16.vlgmr.msra.gmra.mrb[0].mxu0 %vm208_vm9, %v711_v10  ;;  %v854_v8 = vmul.f32 %v2243_v21, %v2881_v12 }
 0x306   :  { %1992 = vmatpush3.bf16.msra.mxu0 %v2441_v45  ;;  %2252 = vrcp.f32 %v1001_v19  ;;  %v1151_v36 = vpop.xlane.xlu1 %1150 }
 0x307   :  { %1993 = vmatprep.subr.bf16.mxu0 %v2443_v46  ;;  %v863_v18 = vpack.c.bf16 %v854_v8, %v853_v44 }
 0x308   :  { %v2245_v32 = vpop.eup %2244 }
 0x309   :  { %v2247_v22 = vpop.eup %2246  ;;  %v1148_v15 = vpop.xlane.xlu0 %1147  ;;  %1995 = vmatprep.mubr.msk.bf16.mxu0 %vm208_vm9, %v863_v18  ;;  %v856_v23 = vmul.f32 %v2245_v32, %v2891_v61 }
 0x30a   :  { %v2249_v37 = vpop.eup %2248  ;;  %1994 = vmatpush3.bf16.msra.mxu0 %v2443_v46  ;;  %2254 = vrcp.f32 %v1148_v15  ;;  %v855_v45 = vmul.f32 %v2247_v22, %v2868_v26  ;;  %v1298_v20 = vpop.xlane.xlu1 %1297 }
 0x30b   :  { %1999 = vmatprep.subr.bf16.mxu0 %v2445_v47  ;;  %2256 = vrcp.f32 %v998_v54  ;;  %v1006_v12 = vmul.f32 %v2249_v37, %v2878_v2 }
 0x30c   :  { %v2251_v42 = vpop.eup %2250  ;;  %2258 = vrcp.f32 %v1145_v29  ;;  %v864_v16 = vpack.c.bf16 %v856_v23, %v855_v45 }
 0x30d   :  { %v1007_v24 = vmul.f32 %v2251_v42, %v2900_v59  ;;  %v1154_v46 = vpop.xlane.xlu0 %1153 }
 0x30e   :  { %2260 = vrcp.f32 %v1154_v46 }
 0x30f   :  { %v1016_v33 = vpack.c.bf16 %v1007_v24, %v1006_v12  ;;  %2262 = vrcp.f32 %v1151_v36 }
 0x310   :  { %v2253_v61 = vpop.eup %2252  ;;  %2264 = vrcp.f32 %v1298_v20 }
 0x311   :  { %1996 = vmatmul.mubr.msk.bf16.vlgmr.msra.gmra.mrb[0].mxu0 %vm208_vm9, %v864_v16  ;;  %v1009_v59 = vmul.f32 %v2253_v61, %v2908_v6 }
 0x312   :  { %2000 = vmatpush3.bf16.msra.mxu0 %v2445_v47  ;;  %2003 = vmatprep.mubr.msk.bf16.mxu0 %vm208_vm9, %v1016_v33 }
 0x313   :  { %2001 = vmatprep.subr.bf16.mxu0 %v2447_v48 }
 0x314   :  { %v2255_v40 = vpop.eup %2254 }
 0x315   :  { %v2257_v26 = vpop.eup %2256  ;;  %v1160_v47 = vmul.f32 %v2255_v40, %v2916_v58 }
 0x316   :  { %2002 = vmatpush3.bf16.msra.mxu0 %v2447_v48  ;;  %v2259_v2 = vpop.eup %2258  ;;  %v1008_v41 = vmul.f32 %v2257_v26, %v2888_v1 }
 0x317   :  { %2007 = vmatprep.subr.bf16.mxu0 %v2449_v49  ;;  %v1159_v53 = vmul.f32 %v2259_v2, %v2897_v5 }
 0x318   :  { %v1017_v35 = vpack.c.bf16 %v1009_v59, %v1008_v41  ;;  %v2261_v48 = vpop.eup %2260  ;;  %v1510_v41 = vld [vmem:[%s3132_s6] sm:$0x1] }
 0x319   :  { %v1169_v7 = vpack.c.bf16 %v1160_v47, %v1159_v53  ;;  %v2263_v6 = vpop.eup %2262  ;;  %v1162_v58 = vmul.f32 %v2261_v48, %v2924_v56  ;;  %v2322_v53 = vmov 4  }
 0x31a   :  { %v1161_v1 = vmul.f32 %v2263_v6, %v2906_v0  ;;  %v2265_v56 = vpop.eup %2264  ;;  %2137 = vset.pattern.permute.xlu1 %v2322_v53  ;;  %2138 = vset.pattern.permute.xlu0 %v2322_v53 }
 0x31b   :  { %v1312_v0 = vmul.f32 %v2265_v56, %v2914_v3  ;;  %v2140_v3 = vld [vmem:[%s3130_s5] sm:$0xff]  }
 0x31c   :  { %v1170_v5 = vpack.c.bf16 %v1162_v58, %v1161_v1  ;;  %2023 = vmatprep.subr.bf16.mxu1 %v2140_v3 }
 0x31d   :  { %2004 = vmatmul.mubr.msk.bf16.vlgmr.msra.gmra.mrb[0].mxu0 %vm208_vm9, %v1017_v35  ;;  %2024 = vmatpush3.bf16.msra.mxu1 %v2140_v3 }
 0x31e   :  { %2008 = vmatpush3.bf16.msra.mxu0 %v2449_v49  ;;  %2011 = vmatprep.mubr.msk.bf16.mxu0 %vm208_vm9, %v1169_v7  ;;  %v1304_v49 = vpop.xlane.xlu1 %1303 }
 0x31f   :  { %2009 = vmatprep.subr.bf16.mxu0 %v2451_v50 }
 0x322   :  { %2010 = vmatpush3.bf16.msra.mxu0 %v2451_v50 }
 0x323   :  { %2015 = vmatprep.subr.bf16.mxu0 %v2453_v51 }
 0x329   :  { %2012 = vmatmul.mubr.msk.bf16.vlgmr.msra.gmra.mrb[0].mxu0 %vm208_vm9, %v1170_v5 }
 0x32a   :  { %2016 = vmatpush3.bf16.msra.mxu0 %v2453_v51 }
 0x32b   :  { %2017 = vmatprep.subr.bf16.mxu0 %v2455_v52 }
 0x32e   :  { %2018 = vmatpush3.bf16.msra.mxu0 %v2455_v52 }
 0x32f   :  { %v1301_v4 = vpop.xlane.xlu0 %1300 }
 0x330   :  { %2266 = vrcp.f32 %v1301_v4 }
 0x331   :  { %2268 = vrcp.f32 %v1304_v49 }
 0x333   :  { %v1307_v50 = vpop.xlane.xlu0 %1306 }
 0x334   :  { %2270 = vrcp.f32 %v1307_v50  ;;  %v3147_v50 = vld [vmem:[#allocation2_spill] sm:$0xff] }
 0x335   :  { %v3148_v56 = vsub.s32 0, %v3147_v50 }
 0x33a   :  { %v2267_v38 = vpop.eup %2266 }
 0x33b   :  { %v1313_v39 = vmul.f32 %v2267_v38, %v2932_v62  ;;  %v2269_v63 = vpop.eup %2268  ;;  %v2142_v62 = vld [vmem:[%s3130_s5 + $0x10] sm:$0xff]  }
 0x33c   :  { %v1314_v17 = vmul.f32 %v2269_v63, %v2922_v34  ;;  %v2141_v34 = vld [vmem:[%s3130_s5 + $0x8] sm:$0xff]  }
 0x33d   :  { %v1322_v9 = vpack.c.bf16 %v1313_v39, %v1312_v0  ;;  %2025 = vmatprep.subr.bf16.mxu1 %v2141_v34 }
 0x33e   :  { %v2271_v51 = vpop.eup %2270  ;;  %2026 = vmatpush3.bf16.msra.mxu1 %v2141_v34 }
 0x33f   :  { %v1315_v31 = vmul.f32 %v2271_v51, %v2936_v28  ;;  %2019 = vmatprep.mubr.msk.bf16.mxu0 %vm208_vm9, %v1322_v9  ;;  %2027 = vmatprep.subr.bf16.mxu1 %v2142_v62  ;;  %v2143_v28 = vld [vmem:[%s3130_s5 + $0x18] sm:$0xff]  }
 0x341   :  { %v1323_v52 = vpack.c.bf16 %v1315_v31, %v1314_v17 }
 0x342   :  { %2028 = vmatpush3.bf16.msra.mxu1 %v2142_v62 }
 0x343   :  { %2020 = vmatmul.mubr.msk.bf16.vlgmr.msra.gmra.mrb[0].mxu0 %vm208_vm9, %v1323_v52  ;;  %2029 = vmatprep.subr.bf16.mxu1 %v2143_v28 }
 0x346   :  { %2030 = vmatpush3.bf16.msra.mxu1 %v2143_v28 }
 0x347   :  { %2035 = vmatprep.subr.bf16.mxu1 %v3145_v25 }
 0x416   :  { %v2021_v14 = vpop.f32.mrb[0].mxu0 }
 0x417   :  { %v1394_v43 = vadd.f32 %v2021_v14, %v1864_v13  ;;  %v1366_v57 = vpop.f32.mrb[1].mxu0 }
 0x418   :  { %v1392_v55 = vadd.f32 %v1864_v13, %v1366_v57  ;;  %v2022_v11 = vpop.f32.mrb[2].mxu0 }
 0x419   :  { %v1402_v10 = vmin.f32 %v1394_v43, 0.0  ;;  %v1395_v21 = vadd.f32 %v2022_v11, %v1864_v13  ;;  %v1369_v54 = vpop.f32.mrb[3].mxu0  ;;  %1805 = vst.msk [vmem:[%s3129_s8 + $0x10] sm:$0xff] %vm1454_vm10, %v1394_v43  ;;  %vm1398_vm11 = vcmp.gt.f32.partialorder %v1394_v43, 0.0 }
 0x41a   :  { %v1400_v19 = vmin.f32 %v1392_v55, 0.0  ;;  %v1393_v44 = vadd.f32 %v1864_v13, %v1369_v54  ;;  %1803 = vst.msk [vmem:[%s3129_s8] sm:$0xff] %vm1454_vm10, %v1392_v55  ;;  %vm1396_vm13 = vcmp.gt.f32.partialorder %v1392_v55, 0.0  ;;  %v3149_v54 = vld [vmem:[#allocation3_spill] sm:$0xff] }
 0x41b   :  { %v1408_v8 = vmul.f32 1.442695, %v1402_v10  ;;  %v1403_v18 = vmin.f32 %v1395_v21, 0.0  ;;  %1806 = vst.msk [vmem:[%s3129_s8 + $0x18] sm:$0xff] %vm1454_vm10, %v1395_v21  ;;  %vm1399_vm12 = vcmp.gt.f32.partialorder %v1395_v21, 0.0 }
 0x41c   :  { %v1404_v32 = vmul.f32 1.442695, %v1400_v19  ;;  %v1401_v22 = vmin.f32 %v1393_v44, 0.0  ;;  %1804 = vst.msk [vmem:[%s3129_s8 + $0x8] sm:$0xff] %vm1454_vm10, %v1393_v44  ;;  %vm1397_vm14 = vcmp.gt.f32.partialorder %v1393_v44, 0.0 }
 0x41d   :  { %2272 = vpow2.f32 %v1408_v8  ;;  %v1410_v15 = vmul.f32 1.442695, %v1403_v18 }
 0x41e   :  { %2274 = vpow2.f32 %v1404_v32  ;;  %v1406_v37 = vmul.f32 1.442695, %v1401_v22 }
 0x41f   :  { %2276 = vpow2.f32 %v1410_v15 }
 0x420   :  { %2278 = vpow2.f32 %v1406_v37 }
 0x427   :  { %v2273_v29 = vpop.eup %2272 }
 0x428   :  { %v2275_v23 = vpop.eup %2274  ;;  %v1867_v42 = vadd.f32 -1.0, %v2273_v29 }
 0x429   :  { %v2277_v45 = vpop.eup %2276  ;;  %v1865_v12 = vadd.f32 -1.0, %v2275_v23 }
 0x42a   :  { %v2279_v24 = vpop.eup %2278  ;;  %v1868_v16 = vadd.f32 -1.0, %v2277_v45  ;;  %v1418_v46 = vsel %vm1398_vm11, %v1394_v43, %v1867_v42 }
 0x42b   :  { %v1866_v33 = vadd.f32 -1.0, %v2279_v24  ;;  %v1416_v36 = vsel %vm1396_vm13, %v1392_v55, %v1865_v12 }
 0x42c   :  { %v1419_v61 = vsel %vm1399_vm12, %v1395_v21, %v1868_v16 }
 0x42d   :  { %v1421_v40 = vpack.c.bf16 %v1419_v61, %v1418_v46  ;;  %v1417_v26 = vsel %vm1397_vm14, %v1393_v44, %v1866_v33 }
 0x42e   :  { %v1420_v2 = vpack.c.bf16 %v1417_v26, %v1416_v36 }
 0x42f   :  { %v1459_v47 = vsel %vm1454_vm10, %v1421_v40, 0 }
 0x430   :  { %2031 = vmatprep.mubr.msk.bf16.mxu1 %vm1454_vm10, %v1420_v2  ;;  %v1456_v59 = vsel %vm1454_vm10, %v1420_v2, 0 }
 0x431   :  { %2032 = vmatmul.mubr.msk.bf16.vlgmr.msra.gmra.mrb[8].mxu1 %vm1454_vm10, %v1421_v40 }
 0x432   :  { %2036 = vmatpush3.bf16.xpose.msra.mxu1 %v1456_v59  ;;  %2039 = vmatprep.mubr.msk.bf16.mxu1 %vm3146_vm15, %v3145_v25 }
 0x433   :  { %2037 = vmatprep.subr.bf16.mxu1 %v3145_v25 }
 0x43a   :  { %2038 = vmatpush3.bf16.xpose.msra.mxu1 %v1459_v47 }
 0x441   :  { %2040 = vmatmul.mubr.msk.bf16.vlgmr.msra.gmra.mrb[12].mxu1 %vm1454_vm10, %v1510_v41 }
 0x504   :  { %v2033_v35 = vpop.f32.mrb[8].mxu1 }
 0x505   :  { %v1495_v7 = vpop.f32.mrb[9].mxu1 }
 0x506   :  { %1556 = vperm.xlu1 %2137, %v1495_v7   ;;  %v2034_v48 = vpop.f32.mrb[10].mxu1 }
 0x507   :  { %v2061_v6 = vpack.c.bf16 %v2034_v48, %v2033_v35  ;;  %v1498_v58 = vpop.f32.mrb[11].mxu1 }
 0x508   :  { %v2057_v1 = vpack.c.bf16 %v1498_v58, %v1495_v7  ;;  %1561 = vperm.xlu0 %2138, %v1498_v58  }
 0x50a   :  { %1566 = vperm.xlu1 %2137, %v2033_v35   ;;  %2058 = vmatprep.subr.bf16.mxu1 %v2057_v1 }
 0x50b   :  { %2060 = vmatpush3.bf16.msra.mxu1 %v2057_v1 }
 0x50c   :  { %2062 = vmatprep.subr.bf16.mxu1 %v2061_v6 }
 0x50e   :  { %1571 = vperm.xlu1 %2137, %v2034_v48  }
 0x50f   :  { %2064 = vmatpush3.bf16.msra.mxu1 %v2061_v6 }
 0x514   :  { %v1548_v5 = vpop.f32.mrb[12].mxu1 }
 0x515   :  { %v2041_v20 = vpop.f32.mrb[13].mxu1  ;;  %v1577_v38 = vrot.slane %v1548_v5, %v3148_v56  ;;  %v1876_v5 = vld [vmem:[%s3133_s7] ss:$0 sm:$0xff]  ;;  %s2323_s7 = smov 64  }
 0x516   :  { %v1551_v49 = vpop.f32.mrb[14].mxu1 }
 0x517   :  { %v2042_v4 = vpop.f32.mrb[15].mxu1 }
 0x585   :  { %v1557_v0 = vpop.permute.xlu1 %1556 }
 0x586   :  { %v1578_v39 = vadd.f32 %v1577_v38, %v1557_v0 }
 0x587   :  { %v1562_v63 = vpop.permute.xlu0 %1561 }
 0x588   :  { %vm1582_vm0 = vcmp.gt.f32.partialorder %v1578_v39, 0.0  ;;  %v1586_v9 = vmul.f32 0.2, %v1578_v39  ;;  %v1579_v51 = vadd.f32 %v1577_v38, %v1562_v63 }
 0x589   :  { %v1567_v17 = vpop.permute.xlu1 %1566 }
 0x58a   :  { %vm1583_vm2 = vcmp.gt.f32.partialorder %v1579_v51, 0.0  ;;  %v1587_v31 = vmul.f32 0.2, %v1579_v51  ;;  %v1580_v52 = vadd.f32 %v1577_v38, %v1567_v17  ;;  %v1590_v25 = vsel %vm1582_vm0, %v1578_v39, %v1586_v9 }
 0x58b   :  { %v1594_v3 = vadd.f32 %v1590_v25, %v2545_v30 }
 0x58c   :  { %vm1584_vm3 = vcmp.gt.f32.partialorder %v1580_v52, 0.0  ;;  %v1588_v34 = vmul.f32 0.2, %v1580_v52  ;;  %v1591_v62 = vsel %vm1583_vm2, %v1579_v51, %v1587_v31 }
 0x58d   :  { %v1572_v28 = vpop.permute.xlu1 %1571  ;;  %v1598_v13 = vsel %vm208_vm9, %v1594_v3, -inf  ;;  %v1595_v14 = vadd.f32 %v1591_v62, %v2601_v60 }
 0x58e   :  { %v1581_v43 = vadd.f32 %v1577_v38, %v1572_v28  ;;  %1599 = vmax.xlane.f32.xlu1 %v1598_v13  ;;  %v1592_v57 = vsel %vm1584_vm3, %v1580_v52, %v1588_v34 }
 0x58f   :  { %v1601_v55 = vsel %vm208_vm9, %v1595_v14, -inf  ;;  %v1596_v11 = vadd.f32 %v1592_v57, %v2543_v27 }
 0x590   :  { %vm1585_vm4 = vcmp.gt.f32.partialorder %v1581_v43, 0.0  ;;  %v1589_v10 = vmul.f32 0.2, %v1581_v43  ;;  %1602 = vmax.xlane.f32.xlu0 %v1601_v55 }
 0x591   :  { %v1604_v30 = vsel %vm208_vm9, %v1596_v11, -inf }
 0x592   :  { %1605 = vmax.xlane.f32.xlu1 %v1604_v30  ;;  %v1593_v21 = vsel %vm1585_vm4, %v1581_v43, %v1589_v10 }
 0x593   :  { %v1597_v19 = vadd.f32 %v1593_v21, %v3149_v54 }
 0x595   :  { %v1607_v44 = vsel %vm208_vm9, %v1597_v19, -inf }
 0x596   :  { %1608 = vmax.xlane.f32.xlu1 %v1607_v44 }
 0x61b   :  { %v1600_v60 = vpop.xlane.xlu1 %1599 }
 0x61c   :  { %v1610_v8 = vsub.f32 %v1594_v3, %v1600_v60 }
 0x61d   :  { %v1603_v18 = vpop.xlane.xlu0 %1602 }
 0x61e   :  { %v1614_v32 = vmul.f32 1.442695, %v1610_v8  ;;  %v1611_v22 = vsub.f32 %v1595_v14, %v1603_v18 }
 0x61f   :  { %v1606_v15 = vpop.xlane.xlu1 %1605 }
 0x620   :  { %2280 = vpow2.f32 %v1614_v32  ;;  %v1616_v27 = vmul.f32 1.442695, %v1611_v22  ;;  %v1612_v37 = vsub.f32 %v1596_v11, %v1606_v15 }
 0x622   :  { %2282 = vpow2.f32 %v1616_v27  ;;  %v1618_v29 = vmul.f32 1.442695, %v1612_v37 }
 0x623   :  { %v1609_v23 = vpop.xlane.xlu1 %1608 }
 0x624   :  { %v1613_v42 = vsub.f32 %v1597_v19, %v1609_v23  ;;  %2284 = vpow2.f32 %v1618_v29 }
 0x626   :  { %v1620_v45 = vmul.f32 1.442695, %v1613_v42 }
 0x628   :  { %2286 = vpow2.f32 %v1620_v45 }
 0x62a   :  { %v2281_v12 = vpop.eup %2280 }
 0x62b   :  { %v1622_v24 = vsel %vm208_vm9, %v2281_v12, 0.0 }
 0x62c   :  { %v2283_v16 = vpop.eup %2282  ;;  %1623 = vadd.xlane.f32.xlu1 %v1622_v24 }
 0x62d   :  { %v1625_v33 = vsel %vm208_vm9, %v2283_v16, 0.0 }
 0x62e   :  { %v2285_v46 = vpop.eup %2284 }
 0x62f   :  { %v1628_v40 = vsel %vm208_vm9, %v2285_v46, 0.0 }
 0x630   :  { %1626 = vadd.xlane.f32.xlu1 %v1625_v33 }
 0x632   :  { %v2287_v61 = vpop.eup %2286 }
 0x633   :  { %v1631_v36 = vsel %vm208_vm9, %v2287_v61, 0.0 }
 0x634   :  { %1629 = vadd.xlane.f32.xlu1 %v1628_v40  ;;  %1632 = vadd.xlane.f32.xlu0 %v1631_v36 }
 0x6b9   :  { %v1624_v26 = vpop.xlane.xlu1 %1623 }
 0x6ba   :  { %2288 = vrcp.f32 %v1624_v26 }
 0x6bd   :  { %v1627_v2 = vpop.xlane.xlu1 %1626 }
 0x6be   :  { %2290 = vrcp.f32 %v1627_v2 }
 0x6c1   :  { %v1633_v59 = vpop.xlane.xlu0 %1632  ;;  %v1630_v47 = vpop.xlane.xlu1 %1629 }
 0x6c2   :  { %2292 = vrcp.f32 %v1633_v59 }
 0x6c3   :  { %2294 = vrcp.f32 %v1630_v47 }
 0x6c4   :  { %v2289_v41 = vpop.eup %2288 }
 0x6c5   :  { %v1638_v53 = vmul.f32 %v2289_v41, %v2281_v12 }
 0x6c7   :  { %2051 = vmatprep.mubr.msk.f32.mxu1 %vm208_vm9, %v1638_v53 }
 0x6c8   :  { %v2291_v35 = vpop.eup %2290 }
 0x6c9   :  { %v1639_v7 = vmul.f32 %v2291_v35, %v2283_v16 }
 0x6cb   :  { %2052 = vmatmul.mubr.msk.f32.vlgmr.msra.gmra.mrb[16].mxu1 %vm208_vm9, %v1639_v7 }
 0x6cc   :  { %v2293_v48 = vpop.eup %2292 }
 0x6cd   :  { %v2295_v6 = vpop.eup %2294  ;;  %v1641_v58 = vmul.f32 %v2293_v48, %v2287_v61 }
 0x6ce   :  { %v1640_v1 = vmul.f32 %v2295_v6, %v2285_v46 }
 0x6d0   :  { %2054 = vmatprep.mubr.msk.f32.mxu1 %vm208_vm9, %v1640_v1 }
 0x6d1   :  { %2055 = vmatmul.mubr.msk.f32.gmra.mrb[18].mxu1 %vm208_vm9, %v1641_v58  ;;  %vm1823_vm9 = vcmask 556544  }
 0x79e   :  { %v2053_v20 = vpop.f32.mrb[16].mxu1 }
 0x79f   :  { %v1733_v49 = vadd.f32 %v2053_v20, %v1876_v5  ;;  %v1727_v4 = vpop.f32.mrb[17].mxu1 }
 0x7a0   :  { %v3095_v50 = vadd.f32 %v1876_v5, %v1727_v4 }
 0x7a1   :  { %v1750_v56 = vsel %vm1746_vm5, %v1733_v49, -inf }
 0x7a2   :  { %1751 = vmax.xlane.f32.xlu0 %v1750_v56  ;;  %v1747_v38 = vsel %vm1746_vm5, %v3095_v50, -inf }
 0x7a3   :  { %1748 = vmax.xlane.f32.xlu1 %v1747_v38 }
 0x7a4   :  { %v2056_v0 = vpop.f32.mrb[18].mxu1 }
 0x7a5   :  { %v3100_v39 = vadd.f32 %v2056_v0, %v1876_v5  ;;  %v1737_v63 = vpop.f32.mrb[19].mxu1 }
 0x7a6   :  { %v1738_v9 = vadd.f32 %v1876_v5, %v1737_v63 }
 0x7a7   :  { %v1756_v51 = vsel %vm1746_vm5, %v3100_v39, -inf }
 0x7a8   :  { %1757 = vmax.xlane.f32.xlu0 %v1756_v51  ;;  %v1753_v17 = vsel %vm1746_vm5, %v1738_v9, -inf }
 0x7a9   :  { %1754 = vmax.xlane.f32.xlu1 %v1753_v17 }
 0x82f   :  { %v1752_v31 = vpop.xlane.xlu0 %1751 }
 0x830   :  { %v1760_v52 = vsub.f32 %v1733_v49, %v1752_v31  ;;  %v1749_v25 = vpop.xlane.xlu1 %1748 }
 0x831   :  { %v1759_v3 = vsub.f32 %v3095_v50, %v1749_v25 }
 0x832   :  { %v1765_v34 = vmul.f32 1.442695, %v1760_v52 }
 0x833   :  { %v1763_v62 = vmul.f32 1.442695, %v1759_v3 }
 0x834   :  { %2296 = vpow2.f32 %v1765_v34 }
 0x835   :  { %2298 = vpow2.f32 %v1763_v62  ;;  %v1758_v28 = vpop.xlane.xlu0 %1757 }
 0x836   :  { %v1762_v13 = vsub.f32 %v3100_v39, %v1758_v28  ;;  %v1755_v14 = vpop.xlane.xlu1 %1754 }
 0x837   :  { %v1761_v43 = vsub.f32 %v1738_v9, %v1755_v14 }
 0x838   :  { %v1769_v57 = vmul.f32 1.442695, %v1762_v13 }
 0x839   :  { %v1767_v55 = vmul.f32 1.442695, %v1761_v43 }
 0x83a   :  { %2300 = vpow2.f32 %v1769_v57 }
 0x83b   :  { %2302 = vpow2.f32 %v1767_v55 }
 0x83e   :  { %v2297_v11 = vpop.eup %2296 }
 0x83f   :  { %v2299_v10 = vpop.eup %2298  ;;  %v1774_v30 = vsel %vm1746_vm5, %v2297_v11, 0.0 }
 0x840   :  { %1775 = vadd.xlane.f32.xlu0 %v1774_v30  ;;  %v1771_v21 = vsel %vm1746_vm5, %v2299_v10, 0.0 }
 0x841   :  { %1772 = vadd.xlane.f32.xlu1 %v1771_v21 }
 0x844   :  { %v2301_v54 = vpop.eup %2300 }
 0x845   :  { %v2303_v19 = vpop.eup %2302  ;;  %v1780_v44 = vsel %vm1746_vm5, %v2301_v54, 0.0 }
 0x846   :  { %1781 = vadd.xlane.f32.xlu0 %v1780_v44  ;;  %v1777_v60 = vsel %vm1746_vm5, %v2303_v19, 0.0 }
 0x847   :  { %1778 = vadd.xlane.f32.xlu1 %v1777_v60 }
 0x8cd   :  { %v1776_v8 = vpop.xlane.xlu0 %1775 }
 0x8ce   :  { %2304 = vlog2.f32 %v1776_v8  ;;  %v1773_v18 = vpop.xlane.xlu1 %1772 }
 0x8cf   :  { %2306 = vlog2.f32 %v1773_v18 }
 0x8d3   :  { %v1782_v32 = vpop.xlane.xlu0 %1781 }
 0x8d4   :  { %2308 = vlog2.f32 %v1782_v32  ;;  %v1779_v22 = vpop.xlane.xlu1 %1778 }
 0x8d5   :  { %2310 = vlog2.f32 %v1779_v22 }
 0x8d8   :  { %v2305_v15 = vpop.eup %2304 }
 0x8d9   :  { %v2307_v27 = vpop.eup %2306  ;;  %v1786_v37 = vmul.f32 0.6931472, %v2305_v15 }
 0x8da   :  { %v1784_v29 = vmul.f32 0.6931472, %v2307_v27 }
 0x8db   :  { %v1792_v23 = vadd.f32 %v1786_v37, %v1752_v31 }
 0x8dc   :  { %v1791_v42 = vadd.f32 %v1784_v29, %v1749_v25 }
 0x8dd   :  { %v1796_v45 = vsub.f32 %v1733_v49, %v1792_v23 }
 0x8de   :  { %v2309_v12 = vpop.eup %2308  ;;  %v1795_v24 = vsub.f32 %v3095_v50, %v1791_v42 }
 0x8df   :  { %v2311_v16 = vpop.eup %2310  ;;  %1813 = vrot.lane.b32.xlu0 %v1796_v45, %s2323_s7  ;;  %v1790_v33 = vmul.f32 0.6931472, %v2309_v12 }
 0x8e0   :  { %v1788_v46 = vmul.f32 0.6931472, %v2311_v16  ;;  %1811 = vrot.lane.b32.xlu1 %v1795_v24, %s2323_s7 }
 0x8e1   :  { %v1794_v40 = vadd.f32 %v1790_v33, %v1758_v28 }
 0x8e2   :  { %v1793_v61 = vadd.f32 %v1788_v46, %v1755_v14 }
 0x8e3   :  { %v1798_v26 = vsub.f32 %v3100_v39, %v1794_v40 }
 0x8e4   :  { %v1797_v36 = vsub.f32 %v1738_v9, %v1793_v61 }
 0x8e6   :  { %1815 = vrot.lane.b32.xlu1 %v1797_v36, %s2323_s7 }
 0x8ea   :  { %1817 = vrot.lane.b32.xlu1 %v1798_v26, %s2323_s7 }
 0x951   :  { %v1814_v2 = vpop.permute.xlu0 %1813 }
 0x952   :  { %1825 = vst.msk [vmem:[%s3129_s8 + $0x8] sm:$0xff] %vm1823_vm9, %v1814_v2  ;;  %v1812_v59 = vpop.permute.xlu1 %1811 }
 0x953   :  { %1824 = vst.msk [vmem:[%s3129_s8] sm:$0xff] %vm1823_vm9, %v1812_v59 }
 0x958   :  { %v1816_v47 = vpop.permute.xlu1 %1815 }
 0x959   :  { %1826 = vst.msk [vmem:[%s3129_s8 + $0x10] sm:$0xff] %vm1823_vm9, %v1816_v47 }
 0x95c   :  { %v1818_v41 = vpop.permute.xlu1 %1817 }
 0x95d   :  { %1827 = vst.msk [vmem:[%s3129_s8 + $0x18] sm:$0xff] %vm1823_vm9, %v1818_v41 }

</bundles_post_ra>
